<compile_context>
chip_gen: v5e
topology: v5e:2x2
jax: 0.10.0
libtpu: 0.0.40
codegen_flags: <defaults>
</compile_context>

<pallas_src>
import functools

import numpy as np
import jax
import jax.numpy as jnp
from jax.experimental import pallas as pl
from jax.experimental.pallas import tpu as pltpu


# ------------------------------------------------------------------ kernel ---

def _integration_kernel(new_ref, old_ref, co_ref,
                        nls_ref, nrs_ref, ols_ref, ors_ref, cls_ref, crs_ref,
                        wnx_ref, wgo_ref, wc_ref, wox_ref, woc_ref, rt_ref,
                        out_ref, *, nf0, cw):
    """One (batch, L-tile) grid point.
       new/old: [nf0, T];  co: [4, T] = [3 coord channels; ones];  *_ls/*_rs: halo strips [., S].
       wnx [nf0+2cw, 3*nf0]: rows [new_int; reset_new; update_new], x-channel taps along K.
       wgo [2cw, 3*nf0]:     rows [reset_old; update_old].
       wc  [nf0+2cw, 12]:    coord(+ones/bias) taps; gate rows hold reset/update coord weights summed.
       wox [nf0, 3*nf0], woc [nf0, 12]: old_integration conv (no bias).
       rt  [2*nf0+4, 3]:     transposed reset-gate weights (rows = [new ch; old ch; coord; ones])."""
    T = out_ref.shape[-1]
    S = nls_ref.shape[-1]

    new = new_ref[0]
    old = old_ref[0]
    co = co_ref[...]
    nls, nrs = nls_ref[0], nrs_ref[0]
    ols, ors = ols_ref[0], ors_ref[0]
    cls, crs = cls_ref[...], crs_ref[...]

    t = pl.program_id(1)
    first = t == 0
    last = t == pl.num_programs(1) - 1

    # lane iota / edge masks computed once and reused by all taps
    lane = jax.lax.broadcasted_iota(jnp.int32, (1, T), 1)
    m_lo = lane == 0
    m_hi = lane == T - 1

    def tap_left(x, ls):
        # x at global position g-1 (replication at the global left edge, strip data at tile seams)
        fill = jnp.where(first, x[:, 0:1], ls[:, S - 1:S])
        return jnp.where(m_lo, fill, pltpu.roll(x, 1, axis=1))

    def tap_right(x, rs):
        fill = jnp.where(last, x[:, T - 1:T], rs[:, 0:1])
        return jnp.where(m_hi, fill, pltpu.roll(x, T - 1, axis=1))

    new_l, new_r = tap_left(new, nls), tap_right(new, nrs)
    old_l, old_r = tap_left(old, ols), tap_right(old, ors)
    co_l, co_r = tap_left(co, cls), tap_right(co, crs)

    def conv(w, k, left, center, right):
        acc = jnp.dot(w[:, :k], left, preferred_element_type=jnp.float32)
        acc = acc + jnp.dot(w[:, k:2 * k], center, preferred_element_type=jnp.float32)
        acc = acc + jnp.dot(w[:, 2 * k:], right, preferred_element_type=jnp.float32)
        return acc

    a_new = conv(wnx_ref[...], nf0, new_l, new, new_r)   # [nf0+2cw, T]
    a_old = conv(wgo_ref[...], nf0, old_l, old, old_r)   # [2cw, T]
    a_co = conv(wc_ref[...], 4, co_l, co, co_r)          # [nf0+2cw, T]  (biases via ones channel)

    new_int = a_new[:nf0] + a_co[:nf0]
    gates = jax.nn.sigmoid(a_new[nf0:] + a_old + a_co[nf0:])
    reset = gates[:cw]        # [1, T]
    update = gates[cw:]       # [1, T]

    # --- exact `reset` just outside the tile (needed because conv(reset*old) has receptive
    #     field 5); recomputed from the halo strips with tiny per-column sums.
    rt = rt_ref[...]
    rt_n, rt_o, rt_c = rt[:nf0], rt[nf0:2 * nf0], rt[2 * nf0:]

    def dotcol(w_col, x_col):
        return jnp.sum(w_col * x_col, keepdims=True)      # [1, 1]

    pre_l = (dotcol(rt_n[:, 0:1], nls[:, S - 2:S - 1]) + dotcol(rt_n[:, 1:2], nls[:, S - 1:S])
             + dotcol(rt_n[:, 2:3], new[:, 0:1])
             + dotcol(rt_o[:, 0:1], ols[:, S - 2:S - 1]) + dotcol(rt_o[:, 1:2], ols[:, S - 1:S])
             + dotcol(rt_o[:, 2:3], old[:, 0:1])
             + dotcol(rt_c[:, 0:1], cls[:, S - 2:S - 1]) + dotcol(rt_c[:, 1:2], cls[:, S - 1:S])
             + dotcol(rt_c[:, 2:3], co[:, 0:1]))
    pre_r = (dotcol(rt_n[:, 0:1], new[:, T - 1:T]) + dotcol(rt_n[:, 1:2], nrs[:, 0:1])
             + dotcol(rt_n[:, 2:3], nrs[:, 1:2])
             + dotcol(rt_o[:, 0:1], old[:, T - 1:T]) + dotcol(rt_o[:, 1:2], ors[:, 0:1])
             + dotcol(rt_o[:, 2:3], ors[:, 1:2])
             + dotcol(rt_c[:, 0:1], co[:, T - 1:T]) + dotcol(rt_c[:, 1:2], crs[:, 0:1])
             + dotcol(rt_c[:, 2:3], crs[:, 1:2]))
    r_ext_l = jax.nn.sigmoid(pre_l)     # reset at global position (tile_start - 1)
    r_ext_r = jax.nn.sigmoid(pre_r)     # reset at global position (tile_end)

    # --- taps of the gated product reset*[old; coord].  ReplicationPad applies to the *product*
    #     at the global edges; at interior tile seams the exact neighbour product is used.
    p_old = reset * old       # [nf0, T]
    p_co = reset * co         # [4, T]

    def gtap_left(p, ls_x):
        fill = jnp.where(first, p[:, 0:1], r_ext_l * ls_x[:, S - 1:S])
        return jnp.where(m_lo, fill, pltpu.roll(p, 1, axis=1))

    def gtap_right(p, rs_x):
        fill = jnp.where(last, p[:, T - 1:T], r_ext_r * rs_x[:, 0:1])
        return jnp.where(m_hi, fill, pltpu.roll(p, T - 1, axis=1))

    old_int = (conv(wox_ref[...], nf0, gtap_left(p_old, ols), p_old, gtap_right(p_old, ors))
               + conv(woc_ref[...], 4, gtap_left(p_co, cls), p_co, gtap_right(p_co, crs)))

    final = jnp.maximum(new_int + old_int, 0.0)
    out_ref[0] = (1.0 - update) * old + update * final


# ----------------------------------------------------------------- wrapper ---

def _pick_tile_l(L, cap=4096):
    """Largest 128-multiple divisor of L (<= cap); caps per-step VMEM for v7x's 64 MiB."""
    if L % 128 != 0:
        return L
    best, t = 128, 128
    while t <= min(L, cap):
        if L % t == 0:
            best = t
        t += 128
    return best


def _fuse_x(w, nf0):
    # PyTorch Conv1d weight [Cout, Cin, 3] -> x-channel taps stacked along K: [Cout, 3*nf0]
    wx = w[:, :nf0, :].astype(jnp.float32)
    return jnp.concatenate([wx[:, :, 0], wx[:, :, 1], wx[:, :, 2]], axis=1)


def _fuse_c(w, nf0, b=None):
    # coord-channel taps + a ones column carrying the bias (center tap only): [Cout, 3*4]
    wc = w[:, nf0:, :].astype(jnp.float32)
    cout = w.shape[0]
    zero = jnp.zeros((cout, 1), jnp.float32)
    bias = zero if b is None else b.reshape(cout, 1).astype(jnp.float32)
    taps = [jnp.concatenate([wc[:, :, j], bias if j == 1 else zero], axis=1) for j in range(3)]
    return jnp.concatenate(taps, axis=1)


def integration_net_octree(new_observation, old_state_octree, params, coord_conv_volume,
                           tile_l=None):
    B, nf0, D0, D1, D2 = new_observation.shape
    L = D0 * D1 * D2
    cw = params["w_reset_old"].shape[0]
    if cw != 1:
        raise NotImplementedError(
            "per_feature=True (weights_channels=nf0) is shape-inconsistent in the reference "
            "forward(); only weights_channels==1 is supported.")
    f32 = jnp.float32

    new_flat = new_observation.reshape(B, nf0, L).astype(f32)
    old_flat = old_state_octree.reshape(B, nf0, L).astype(f32)
    coord = jnp.reshape(coord_conv_volume.astype(f32), (3, L))           # batch-1 coord volume
    coord_ones = jnp.concatenate([coord, jnp.ones((1, L), f32)], axis=0)  # [4, L], built once

    T = _pick_tile_l(L) if tile_l is None else int(tile_l)
    if L % T != 0 or (T % 128 != 0 and T != L):
        raise ValueError(f"tile_l={T} must divide L={L} and be a multiple of 128 (or equal L).")
    nt = L // T
    S = 128 if L >= 128 else L          # halo strip width
    r = max(T // S, 1)                  # strip blocks per tile
    nsb = max(L // S, 1)                # strip blocks in L

    # ---- fused weights (one-time, tiny) ----
    w_new_x = jnp.concatenate([_fuse_x(params["w_new_int"], nf0),
                               _fuse_x(params["w_reset_new"], nf0),
                               _fuse_x(params["w_update_new"], nf0)], axis=0)       # [nf0+2, 3nf0]
    w_gate_old_x = jnp.concatenate([_fuse_x(params["w_reset_old"], nf0),
                                    _fuse_x(params["w_update_old"], nf0)], axis=0)  # [2, 3nf0]
    w_coord = jnp.concatenate([
        _fuse_c(params["w_new_int"], nf0, params["b_new_int"]),
        _fuse_c(params["w_reset_new"], nf0) + _fuse_c(params["w_reset_old"], nf0,
                                                      params["b_reset_old"]),
        _fuse_c(params["w_update_new"], nf0) + _fuse_c(params["w_update_old"], nf0,
                                                       params["b_update_old"]),
    ], axis=0)                                                                       # [nf0+2, 12]
    w_old_int_x = _fuse_x(params["w_old_int"], nf0)                                  # [nf0, 3nf0]
    w_old_int_c = _fuse_c(params["w_old_int"], nf0)                                  # [nf0, 12]
    ones_bias_row = jnp.concatenate([jnp.zeros((1, 1), f32),
                                     params["b_reset_old"].reshape(1, 1).astype(f32),
                                     jnp.zeros((1, 1), f32)], axis=1)
    rt_stack = jnp.concatenate([
        params["w_reset_new"][0, :nf0, :].astype(f32),
        params["w_reset_old"][0, :nf0, :].astype(f32),
        params["w_reset_new"][0, nf0:, :].astype(f32) + params["w_reset_old"][0, nf0:, :].astype(f32),
        ones_bias_row,
    ], axis=0)                                                                        # [2nf0+4, 3]

    # ---- block specs ----
    data_spec = pl.BlockSpec((1, nf0, T), lambda b, i: (b, 0, i))
    coord_spec = pl.BlockSpec((4, T), lambda b, i: (0, i))
    dls_spec = pl.BlockSpec((1, nf0, S), lambda b, i: (b, 0, jnp.maximum(i * r - 1, 0)))
    drs_spec = pl.BlockSpec((1, nf0, S), lambda b, i: (b, 0, jnp.minimum((i + 1) * r, nsb - 1)))
    cls_spec = pl.BlockSpec((4, S), lambda b, i: (0, jnp.maximum(i * r - 1, 0)))
    crs_spec = pl.BlockSpec((4, S), lambda b, i: (0, jnp.minimum((i + 1) * r, nsb - 1)))
    wspec = lambda a: pl.BlockSpec(a.shape, lambda b, i: (0,) * a.ndim)

    out = pl.pallas_call(
        functools.partial(_integration_kernel, nf0=nf0, cw=cw),
        out_shape=jax.ShapeDtypeStruct((B, nf0, L), f32),
        grid=(B, nt),
        in_specs=[data_spec, data_spec, coord_spec,
                  dls_spec, drs_spec, dls_spec, drs_spec, cls_spec, crs_spec,
                  wspec(w_new_x), wspec(w_gate_old_x), wspec(w_coord),
                  wspec(w_old_int_x), wspec(w_old_int_c), wspec(rt_stack)],
        out_specs=pl.BlockSpec((1, nf0, T), lambda b, i: (b, 0, i)),
        compiler_params=pltpu.CompilerParams(dimension_semantics=("parallel", "parallel")),
    )(new_flat, old_flat, coord_ones,
      new_flat, new_flat, old_flat, old_flat, coord_ones, coord_ones,
      w_new_x, w_gate_old_x, w_coord, w_old_int_x, w_old_int_c, rt_stack)

    return out.reshape(B, nf0, D0, D1, D2)


# --------------------------------------------------------- pure-JAX reference ---

def reference_forward(new_observation, old_state_octree, params, coord_conv_volume):
    B, nf0, D, _, _ = new_observation.shape
    coord_b = jnp.broadcast_to(coord_conv_volume, (B, 3, D, D, D))
    old_coord = jnp.concatenate([old_state_octree, coord_b], axis=1).reshape(B, nf0 + 3, -1)
    new_coord = jnp.concatenate([new_observation, coord_b], axis=1).reshape(B, nf0 + 3, -1)
    old_flat = old_state_octree.reshape(B, nf0, -1)

    def conv1d_rep(x, w, b=None):
        xp = jnp.pad(x, ((0, 0), (0, 0), (1, 1)), mode="edge")
        y = jax.lax.conv_general_dilated(xp, w, window_strides=(1,), padding="VALID",
                                         dimension_numbers=("NCH", "OIH", "NCH"))
        if b is not None:
            y = y + b[None, :, None]
        return y

    reset = jax.nn.sigmoid(conv1d_rep(old_coord, params["w_reset_old"], params["b_reset_old"])
                           + conv1d_rep(new_coord, params["w_reset_new"]))
    update = jax.nn.sigmoid(conv1d_rep(old_coord, params["w_update_old"], params["b_update_old"])
                            + conv1d_rep(new_coord, params["w_update_new"]))
    final = jax.nn.relu(conv1d_rep(new_coord, params["w_new_int"], params["b_new_int"])
                        + conv1d_rep(reset * old_coord, params["w_old_int"]))
    result = (1.0 - update) * old_flat + update * final
    return result.reshape(B, nf0, D, D, D)


# -------------------------------------------------------------------- main ---

def init_params(key, nf0, weights_channels):
    cin = nf0 + 3

    def conv_w(k, cout):
        bound = 1.0 / np.sqrt(cin * 3)
        return jax.random.uniform(k, (cout, cin, 3), jnp.float32, -bound, bound)

    ks = jax.random.split(key, 9)
    return {
        "w_new_int": conv_w(ks[0], nf0),
        "b_new_int": 0.1 * jax.random.normal(ks[1], (nf0,), jnp.float32),
        "w_old_int": conv_w(ks[2], nf0),
        "w_update_old": conv_w(ks[3], weights_channels),
        "b_update_old": 0.1 * jax.random.normal(ks[4], (weights_channels,), jnp.float32),
        "w_update_new": conv_w(ks[5], weights_channels),
        "w_reset_old": conv_w(ks[6], weights_channels),
        "b_reset_old": 0.1 * jax.random.normal(ks[7], (weights_channels,), jnp.float32),
        "w_reset_new": conv_w(ks[8], weights_channels),
    }


if __name__ == "__main__":
    nf0 = 4
    per_feature = False          # weights_channels = 1 (per_feature=True is inconsistent in source)
    grid_dim = 8
    B = 1                        # coord_conv_volume has batch 1; torch.cat requires matching batch
    weights_channels = nf0 if per_feature else 1

    key = jax.random.PRNGKey(0)
    k_new, k_old, k_params = jax.random.split(key, 3)

    new_observation = jax.random.normal(k_new, (B, nf0, grid_dim, grid_dim, grid_dim), jnp.float32)
    old_state_octree = jax.random.normal(k_old, (B, nf0, grid_dim, grid_dim, grid_dim), jnp.float32)
    params = init_params(k_params, nf0, weights_channels)

    # coord_conv_volume = mgrid[-g//2:g//2]^3 / g, shape [1, 3, D, D, D]
    start, stop = -grid_dim // 2, grid_dim // 2
    rng = jnp.arange(start, stop, dtype=jnp.float32)
    g0, g1, g2 = jnp.meshgrid(rng, rng, rng, indexing="ij")
    coord_conv_volume = (jnp.stack([g0, g1, g2], axis=0) / grid_dim)[None]

    ref = reference_forward(new_observation, old_state_octree, params, coord_conv_volume)

    # default tile choice (single 512-lane tile at this small demo size)
    out = integration_net_octree(new_observation, old_state_octree, params, coord_conv_volume)
    out = jax.block_until_ready(out)
    np.testing.assert_allclose(np.asarray(out), np.asarray(ref), rtol=1e-4, atol=1e-4)

    # exercise the multi-tile / halo-strip path: 4 tiles of 128 lanes
    out_tiled = integration_net_octree(new_observation, old_state_octree, params,
                                       coord_conv_volume, tile_l=128)
    out_tiled = jax.block_until_ready(out_tiled)
    np.testing.assert_allclose(np.asarray(out_tiled), np.asarray(ref), rtol=1e-4, atol=1e-4)

    print("KERNEL_OK")
</pallas_src>

<mosaic_0001>
module attributes {stable_mosaic.version = 11 : i64} {
  func.func @_integration_kernel(%arg0: i32, %arg1: i32, %arg2: memref<1x4x512xf32, #tpu.memory_space<vmem>>, %arg3: memref<1x4x512xf32, #tpu.memory_space<vmem>>, %arg4: memref<4x512xf32, #tpu.memory_space<vmem>>, %arg5: memref<1x4x128xf32, #tpu.memory_space<vmem>>, %arg6: memref<1x4x128xf32, #tpu.memory_space<vmem>>, %arg7: memref<1x4x128xf32, #tpu.memory_space<vmem>>, %arg8: memref<1x4x128xf32, #tpu.memory_space<vmem>>, %arg9: memref<4x128xf32, #tpu.memory_space<vmem>>, %arg10: memref<4x128xf32, #tpu.memory_space<vmem>>, %arg11: memref<6x12xf32, #tpu.memory_space<vmem>>, %arg12: memref<2x12xf32, #tpu.memory_space<vmem>>, %arg13: memref<6x12xf32, #tpu.memory_space<vmem>>, %arg14: memref<4x12xf32, #tpu.memory_space<vmem>>, %arg15: memref<4x12xf32, #tpu.memory_space<vmem>>, %arg16: memref<12x3xf32, #tpu.memory_space<vmem>>, %arg17: memref<1x4x512xf32, #tpu.memory_space<vmem>>) attributes {dimension_semantics = [#tpu.dimension_semantics<parallel>, #tpu.dimension_semantics<parallel>], iteration_bounds = array<i64: 1, 1>, scalar_prefetch = 0 : i64, scratch_operands = 0 : i64, tpu.core_type = #tpu.core_type<tc>, window_params = [{transform_indices = @transform_0, window_bounds = array<i64: 1, 4, 512>}, {transform_indices = @transform_1, window_bounds = array<i64: 1, 4, 512>}, {transform_indices = @transform_2, window_bounds = array<i64: 4, 512>}, {transform_indices = @transform_3, window_bounds = array<i64: 1, 4, 128>}, {transform_indices = @transform_4, window_bounds = array<i64: 1, 4, 128>}, {transform_indices = @transform_5, window_bounds = array<i64: 1, 4, 128>}, {transform_indices = @transform_6, window_bounds = array<i64: 1, 4, 128>}, {transform_indices = @transform_7, window_bounds = array<i64: 4, 128>}, {transform_indices = @transform_8, window_bounds = array<i64: 4, 128>}, {pipeline_mode = #tpu.pipeline_mode<synchronous>, transform_indices = @transform_9, window_bounds = array<i64: 6, 12>}, {pipeline_mode = #tpu.pipeline_mode<synchronous>, transform_indices = @transform_10, window_bounds = array<i64: 2, 12>}, {pipeline_mode = #tpu.pipeline_mode<synchronous>, transform_indices = @transform_11, window_bounds = array<i64: 6, 12>}, {pipeline_mode = #tpu.pipeline_mode<synchronous>, transform_indices = @transform_12, window_bounds = array<i64: 4, 12>}, {pipeline_mode = #tpu.pipeline_mode<synchronous>, transform_indices = @transform_13, window_bounds = array<i64: 4, 12>}, {pipeline_mode = #tpu.pipeline_mode<synchronous>, transform_indices = @transform_14, window_bounds = array<i64: 12, 3>}, {transform_indices = @transform_15, window_bounds = array<i64: 1, 4, 512>}]} {
    %c0 = arith.constant 0 : index
    %c0_0 = arith.constant 0 : index
    %c0_1 = arith.constant 0 : index
    %0 = vector.load %arg2[%c0, %c0_0, %c0_1] : memref<1x4x512xf32, #tpu.memory_space<vmem>>, vector<1x4x512xf32>
    %1 = vector.shape_cast %0 : vector<1x4x512xf32> to vector<4x512xf32>
    %c0_2 = arith.constant 0 : index
    %c0_3 = arith.constant 0 : index
    %c0_4 = arith.constant 0 : index
    %2 = vector.load %arg3[%c0_2, %c0_3, %c0_4] : memref<1x4x512xf32, #tpu.memory_space<vmem>>, vector<1x4x512xf32>
    %3 = vector.shape_cast %2 : vector<1x4x512xf32> to vector<4x512xf32>
    %c0_5 = arith.constant 0 : index
    %c0_6 = arith.constant 0 : index
    %4 = vector.load %arg4[%c0_5, %c0_6] : memref<4x512xf32, #tpu.memory_space<vmem>>, vector<4x512xf32>
    %c0_7 = arith.constant 0 : index
    %c0_8 = arith.constant 0 : index
    %c0_9 = arith.constant 0 : index
    %5 = vector.load %arg5[%c0_7, %c0_8, %c0_9] : memref<1x4x128xf32, #tpu.memory_space<vmem>>, vector<1x4x128xf32>
    %6 = vector.shape_cast %5 : vector<1x4x128xf32> to vector<4x128xf32>
    %c0_10 = arith.constant 0 : index
    %c0_11 = arith.constant 0 : index
    %c0_12 = arith.constant 0 : index
    %7 = vector.load %arg6[%c0_10, %c0_11, %c0_12] : memref<1x4x128xf32, #tpu.memory_space<vmem>>, vector<1x4x128xf32>
    %8 = vector.shape_cast %7 : vector<1x4x128xf32> to vector<4x128xf32>
    %c0_13 = arith.constant 0 : index
    %c0_14 = arith.constant 0 : index
    %c0_15 = arith.constant 0 : index
    %9 = vector.load %arg7[%c0_13, %c0_14, %c0_15] : memref<1x4x128xf32, #tpu.memory_space<vmem>>, vector<1x4x128xf32>
    %10 = vector.shape_cast %9 : vector<1x4x128xf32> to vector<4x128xf32>
    %c0_16 = arith.constant 0 : index
    %c0_17 = arith.constant 0 : index
    %c0_18 = arith.constant 0 : index
    %11 = vector.load %arg8[%c0_16, %c0_17, %c0_18] : memref<1x4x128xf32, #tpu.memory_space<vmem>>, vector<1x4x128xf32>
    %12 = vector.shape_cast %11 : vector<1x4x128xf32> to vector<4x128xf32>
    %c0_19 = arith.constant 0 : index
    %c0_20 = arith.constant 0 : index
    %13 = vector.load %arg9[%c0_19, %c0_20] : memref<4x128xf32, #tpu.memory_space<vmem>>, vector<4x128xf32>
    %c0_21 = arith.constant 0 : index
    %c0_22 = arith.constant 0 : index
    %14 = vector.load %arg10[%c0_21, %c0_22] : memref<4x128xf32, #tpu.memory_space<vmem>>, vector<4x128xf32>
    %c0_i32 = arith.constant 0 : i32
    %15 = arith.cmpi eq, %arg1, %c0_i32 : i32
    %c0_i32_23 = arith.constant 0 : i32
    %16 = arith.cmpi eq, %arg1, %c0_i32_23 : i32
    %17 = tpu.iota {dimensions = array<i32: 1>} : vector<1x512xi32>
    %c0_i32_24 = arith.constant 0 : i32
    %18 = vector.broadcast %c0_i32_24 : i32 to vector<1x512xi32>
    %19 = arith.cmpi eq, %17, %18 : vector<1x512xi32>
    %c511_i32 = arith.constant 511 : i32
    %20 = vector.broadcast %c511_i32 : i32 to vector<1x512xi32>
    %21 = arith.cmpi eq, %17, %20 : vector<1x512xi32>
    %22 = vector.extract_strided_slice %1 {offsets = [0, 0], sizes = [4, 1], strides = [1, 1]} : vector<4x512xf32> to vector<4x1xf32>
    %23 = vector.extract_strided_slice %6 {offsets = [0, 127], sizes = [4, 1], strides = [1, 1]} : vector<4x128xf32> to vector<4x1xf32>
    %24 = arith.select %15, %22, %23 : vector<4x1xf32>
    %c1_i32 = arith.constant 1 : i32
    %25 = tpu.dynamic_rotate %1 by %c1_i32 dim 1 : vector<4x512xf32>, i32 -> vector<4x512xf32>
    %26 = vector.shape_cast %19 : vector<1x512xi1> to vector<1x512xi1>
    %27 = vector.broadcast %26 : vector<1x512xi1> to vector<4x512xi1>
    %28 = vector.shape_cast %24 : vector<4x1xf32> to vector<4x1xf32>
    %29 = vector.broadcast %28 : vector<4x1xf32> to vector<4x512xf32>
    %30 = arith.select %27, %29, %25 : vector<4x512xi1>, vector<4x512xf32>
    %31 = vector.extract_strided_slice %1 {offsets = [0, 511], sizes = [4, 1], strides = [1, 1]} : vector<4x512xf32> to vector<4x1xf32>
    %32 = vector.extract_strided_slice %8 {offsets = [0, 0], sizes = [4, 1], strides = [1, 1]} : vector<4x128xf32> to vector<4x1xf32>
    %33 = arith.select %16, %31, %32 : vector<4x1xf32>
    %c511_i32_25 = arith.constant 511 : i32
    %34 = tpu.dynamic_rotate %1 by %c511_i32_25 dim 1 : vector<4x512xf32>, i32 -> vector<4x512xf32>
    %35 = vector.shape_cast %21 : vector<1x512xi1> to vector<1x512xi1>
    %36 = vector.broadcast %35 : vector<1x512xi1> to vector<4x512xi1>
    %37 = vector.shape_cast %33 : vector<4x1xf32> to vector<4x1xf32>
    %38 = vector.broadcast %37 : vector<4x1xf32> to vector<4x512xf32>
    %39 = arith.select %36, %38, %34 : vector<4x512xi1>, vector<4x512xf32>
    %40 = vector.extract_strided_slice %3 {offsets = [0, 0], sizes = [4, 1], strides = [1, 1]} : vector<4x512xf32> to vector<4x1xf32>
    %41 = vector.extract_strided_slice %10 {offsets = [0, 127], sizes = [4, 1], strides = [1, 1]} : vector<4x128xf32> to vector<4x1xf32>
    %42 = arith.select %15, %40, %41 : vector<4x1xf32>
    %c1_i32_26 = arith.constant 1 : i32
    %43 = tpu.dynamic_rotate %3 by %c1_i32_26 dim 1 : vector<4x512xf32>, i32 -> vector<4x512xf32>
    %44 = vector.shape_cast %19 : vector<1x512xi1> to vector<1x512xi1>
    %45 = vector.broadcast %44 : vector<1x512xi1> to vector<4x512xi1>
    %46 = vector.shape_cast %42 : vector<4x1xf32> to vector<4x1xf32>
    %47 = vector.broadcast %46 : vector<4x1xf32> to vector<4x512xf32>
    %48 = arith.select %45, %47, %43 : vector<4x512xi1>, vector<4x512xf32>
    %49 = vector.extract_strided_slice %3 {offsets = [0, 511], sizes = [4, 1], strides = [1, 1]} : vector<4x512xf32> to vector<4x1xf32>
    %50 = vector.extract_strided_slice %12 {offsets = [0, 0], sizes = [4, 1], strides = [1, 1]} : vector<4x128xf32> to vector<4x1xf32>
    %51 = arith.select %16, %49, %50 : vector<4x1xf32>
    %c511_i32_27 = arith.constant 511 : i32
    %52 = tpu.dynamic_rotate %3 by %c511_i32_27 dim 1 : vector<4x512xf32>, i32 -> vector<4x512xf32>
    %53 = vector.shape_cast %21 : vector<1x512xi1> to vector<1x512xi1>
    %54 = vector.broadcast %53 : vector<1x512xi1> to vector<4x512xi1>
    %55 = vector.shape_cast %51 : vector<4x1xf32> to vector<4x1xf32>
    %56 = vector.broadcast %55 : vector<4x1xf32> to vector<4x512xf32>
    %57 = arith.select %54, %56, %52 : vector<4x512xi1>, vector<4x512xf32>
    %58 = vector.extract_strided_slice %4 {offsets = [0, 0], sizes = [4, 1], strides = [1, 1]} : vector<4x512xf32> to vector<4x1xf32>
    %59 = vector.extract_strided_slice %13 {offsets = [0, 127], sizes = [4, 1], strides = [1, 1]} : vector<4x128xf32> to vector<4x1xf32>
    %60 = arith.select %15, %58, %59 : vector<4x1xf32>
    %c1_i32_28 = arith.constant 1 : i32
    %61 = tpu.dynamic_rotate %4 by %c1_i32_28 dim 1 : vector<4x512xf32>, i32 -> vector<4x512xf32>
    %62 = vector.shape_cast %19 : vector<1x512xi1> to vector<1x512xi1>
    %63 = vector.broadcast %62 : vector<1x512xi1> to vector<4x512xi1>
    %64 = vector.shape_cast %60 : vector<4x1xf32> to vector<4x1xf32>
    %65 = vector.broadcast %64 : vector<4x1xf32> to vector<4x512xf32>
    %66 = arith.select %63, %65, %61 : vector<4x512xi1>, vector<4x512xf32>
    %67 = vector.extract_strided_slice %4 {offsets = [0, 511], sizes = [4, 1], strides = [1, 1]} : vector<4x512xf32> to vector<4x1xf32>
    %68 = vector.extract_strided_slice %14 {offsets = [0, 0], sizes = [4, 1], strides = [1, 1]} : vector<4x128xf32> to vector<4x1xf32>
    %69 = arith.select %16, %67, %68 : vector<4x1xf32>
    %c511_i32_29 = arith.constant 511 : i32
    %70 = tpu.dynamic_rotate %4 by %c511_i32_29 dim 1 : vector<4x512xf32>, i32 -> vector<4x512xf32>
    %71 = vector.shape_cast %21 : vector<1x512xi1> to vector<1x512xi1>
    %72 = vector.broadcast %71 : vector<1x512xi1> to vector<4x512xi1>
    %73 = vector.shape_cast %69 : vector<4x1xf32> to vector<4x1xf32>
    %74 = vector.broadcast %73 : vector<4x1xf32> to vector<4x512xf32>
    %75 = arith.select %72, %74, %70 : vector<4x512xi1>, vector<4x512xf32>
    %c0_30 = arith.constant 0 : index
    %c0_31 = arith.constant 0 : index
    %76 = vector.load %arg11[%c0_30, %c0_31] : memref<6x12xf32, #tpu.memory_space<vmem>>, vector<6x12xf32>
    %77 = vector.extract_strided_slice %76 {offsets = [0, 0], sizes = [6, 4], strides = [1, 1]} : vector<6x12xf32> to vector<6x4xf32>
    %cst = arith.constant dense<0.000000e+00> : vector<6x512xf32>
    %78 = tpu.matmul %77, %30, %cst {dimension_numbers = #tpu.dot_dimension_numbers<[1], [0], [0], [1], [0, 0, 1, 1], [], []>} : vector<6x4xf32>, vector<4x512xf32>, vector<6x512xf32> -> vector<6x512xf32>
    %79 = vector.extract_strided_slice %76 {offsets = [0, 4], sizes = [6, 4], strides = [1, 1]} : vector<6x12xf32> to vector<6x4xf32>
    %cst_32 = arith.constant dense<0.000000e+00> : vector<6x512xf32>
    %80 = tpu.matmul %79, %1, %cst_32 {dimension_numbers = #tpu.dot_dimension_numbers<[1], [0], [0], [1], [0, 0, 1, 1], [], []>} : vector<6x4xf32>, vector<4x512xf32>, vector<6x512xf32> -> vector<6x512xf32>
    %81 = arith.addf %78, %80 : vector<6x512xf32>
    %82 = vector.extract_strided_slice %76 {offsets = [0, 8], sizes = [6, 4], strides = [1, 1]} : vector<6x12xf32> to vector<6x4xf32>
    %cst_33 = arith.constant dense<0.000000e+00> : vector<6x512xf32>
    %83 = tpu.matmul %82, %39, %cst_33 {dimension_numbers = #tpu.dot_dimension_numbers<[1], [0], [0], [1], [0, 0, 1, 1], [], []>} : vector<6x4xf32>, vector<4x512xf32>, vector<6x512xf32> -> vector<6x512xf32>
    %84 = arith.addf %81, %83 : vector<6x512xf32>
    %c0_34 = arith.constant 0 : index
    %c0_35 = arith.constant 0 : index
    %85 = vector.load %arg12[%c0_34, %c0_35] : memref<2x12xf32, #tpu.memory_space<vmem>>, vector<2x12xf32>
    %86 = vector.extract_strided_slice %85 {offsets = [0, 0], sizes = [2, 4], strides = [1, 1]} : vector<2x12xf32> to vector<2x4xf32>
    %cst_36 = arith.constant dense<0.000000e+00> : vector<2x512xf32>
    %87 = tpu.matmul %86, %48, %cst_36 {dimension_numbers = #tpu.dot_dimension_numbers<[1], [0], [0], [1], [0, 0, 1, 1], [], []>} : vector<2x4xf32>, vector<4x512xf32>, vector<2x512xf32> -> vector<2x512xf32>
    %88 = vector.extract_strided_slice %85 {offsets = [0, 4], sizes = [2, 4], strides = [1, 1]} : vector<2x12xf32> to vector<2x4xf32>
    %cst_37 = arith.constant dense<0.000000e+00> : vector<2x512xf32>
    %89 = tpu.matmul %88, %3, %cst_37 {dimension_numbers = #tpu.dot_dimension_numbers<[1], [0], [0], [1], [0, 0, 1, 1], [], []>} : vector<2x4xf32>, vector<4x512xf32>, vector<2x512xf32> -> vector<2x512xf32>
    %90 = arith.addf %87, %89 : vector<2x512xf32>
    %91 = vector.extract_strided_slice %85 {offsets = [0, 8], sizes = [2, 4], strides = [1, 1]} : vector<2x12xf32> to vector<2x4xf32>
    %cst_38 = arith.constant dense<0.000000e+00> : vector<2x512xf32>
    %92 = tpu.matmul %91, %57, %cst_38 {dimension_numbers = #tpu.dot_dimension_numbers<[1], [0], [0], [1], [0, 0, 1, 1], [], []>} : vector<2x4xf32>, vector<4x512xf32>, vector<2x512xf32> -> vector<2x512xf32>
    %93 = arith.addf %90, %92 : vector<2x512xf32>
    %c0_39 = arith.constant 0 : index
    %c0_40 = arith.constant 0 : index
    %94 = vector.load %arg13[%c0_39, %c0_40] : memref<6x12xf32, #tpu.memory_space<vmem>>, vector<6x12xf32>
    %95 = vector.extract_strided_slice %94 {offsets = [0, 0], sizes = [6, 4], strides = [1, 1]} : vector<6x12xf32> to vector<6x4xf32>
    %cst_41 = arith.constant dense<0.000000e+00> : vector<6x512xf32>
    %96 = tpu.matmul %95, %66, %cst_41 {dimension_numbers = #tpu.dot_dimension_numbers<[1], [0], [0], [1], [0, 0, 1, 1], [], []>} : vector<6x4xf32>, vector<4x512xf32>, vector<6x512xf32> -> vector<6x512xf32>
    %97 = vector.extract_strided_slice %94 {offsets = [0, 4], sizes = [6, 4], strides = [1, 1]} : vector<6x12xf32> to vector<6x4xf32>
    %cst_42 = arith.constant dense<0.000000e+00> : vector<6x512xf32>
    %98 = tpu.matmul %97, %4, %cst_42 {dimension_numbers = #tpu.dot_dimension_numbers<[1], [0], [0], [1], [0, 0, 1, 1], [], []>} : vector<6x4xf32>, vector<4x512xf32>, vector<6x512xf32> -> vector<6x512xf32>
    %99 = arith.addf %96, %98 : vector<6x512xf32>
    %100 = vector.extract_strided_slice %94 {offsets = [0, 8], sizes = [6, 4], strides = [1, 1]} : vector<6x12xf32> to vector<6x4xf32>
    %cst_43 = arith.constant dense<0.000000e+00> : vector<6x512xf32>
    %101 = tpu.matmul %100, %75, %cst_43 {dimension_numbers = #tpu.dot_dimension_numbers<[1], [0], [0], [1], [0, 0, 1, 1], [], []>} : vector<6x4xf32>, vector<4x512xf32>, vector<6x512xf32> -> vector<6x512xf32>
    %102 = arith.addf %99, %101 : vector<6x512xf32>
    %103 = vector.extract_strided_slice %84 {offsets = [0, 0], sizes = [4, 512], strides = [1, 1]} : vector<6x512xf32> to vector<4x512xf32>
    %104 = vector.extract_strided_slice %102 {offsets = [0, 0], sizes = [4, 512], strides = [1, 1]} : vector<6x512xf32> to vector<4x512xf32>
    %105 = arith.addf %103, %104 : vector<4x512xf32>
    %106 = vector.extract_strided_slice %84 {offsets = [4, 0], sizes = [2, 512], strides = [1, 1]} : vector<6x512xf32> to vector<2x512xf32>
    %107 = arith.addf %106, %93 : vector<2x512xf32>
    %108 = vector.extract_strided_slice %102 {offsets = [4, 0], sizes = [2, 512], strides = [1, 1]} : vector<6x512xf32> to vector<2x512xf32>
    %109 = arith.addf %107, %108 : vector<2x512xf32>
    %110 = arith.negf %109 : vector<2x512xf32>
    %111 = math.exp %110 : vector<2x512xf32>
    %cst_44 = arith.constant 1.000000e+00 : f32
    %112 = vector.broadcast %cst_44 : f32 to vector<2x512xf32>
    %113 = arith.addf %112, %111 : vector<2x512xf32>
    %114 = arith.divf %112, %113 : vector<2x512xf32>
    %115 = vector.extract_strided_slice %114 {offsets = [0, 0], sizes = [1, 512], strides = [1, 1]} : vector<2x512xf32> to vector<1x512xf32>
    %116 = vector.extract_strided_slice %114 {offsets = [1, 0], sizes = [1, 512], strides = [1, 1]} : vector<2x512xf32> to vector<1x512xf32>
    %c0_45 = arith.constant 0 : index
    %c0_46 = arith.constant 0 : index
    %117 = vector.load %arg16[%c0_45, %c0_46] : memref<12x3xf32, #tpu.memory_space<vmem>>, vector<12x3xf32>
    %118 = vector.extract_strided_slice %117 {offsets = [0, 0], sizes = [4, 3], strides = [1, 1]} : vector<12x3xf32> to vector<4x3xf32>
    %119 = vector.extract_strided_slice %117 {offsets = [4, 0], sizes = [4, 3], strides = [1, 1]} : vector<12x3xf32> to vector<4x3xf32>
    %120 = vector.extract_strided_slice %117 {offsets = [8, 0], sizes = [4, 3], strides = [1, 1]} : vector<12x3xf32> to vector<4x3xf32>
    %121 = vector.extract_strided_slice %118 {offsets = [0, 0], sizes = [4, 1], strides = [1, 1]} : vector<4x3xf32> to vector<4x1xf32>
    %122 = vector.extract_strided_slice %6 {offsets = [0, 126], sizes = [4, 1], strides = [1, 1]} : vector<4x128xf32> to vector<4x1xf32>
    %123 = arith.mulf %121, %122 : vector<4x1xf32>
    %124 = vector.shape_cast %123 : vector<4x1xf32> to vector<1x4x1xf32>
    %cst_47 = arith.constant dense<0.000000e+00> : vector<1xf32>
    %125 = vector.multi_reduction <add>, %124, %cst_47 [1, 2] : vector<1x4x1xf32> to vector<1xf32>
    %126 = vector.shape_cast %125 : vector<1xf32> to vector<1x1x1xf32>
    %127 = vector.extract %126[0, 0, 0] : f32 from vector<1x1x1xf32>
    %128 = vector.broadcast %127 : f32 to vector<1x1xf32>
    %129 = vector.extract_strided_slice %118 {offsets = [0, 1], sizes = [4, 1], strides = [1, 1]} : vector<4x3xf32> to vector<4x1xf32>
    %130 = vector.extract_strided_slice %6 {offsets = [0, 127], sizes = [4, 1], strides = [1, 1]} : vector<4x128xf32> to vector<4x1xf32>
    %131 = arith.mulf %129, %130 : vector<4x1xf32>
    %132 = vector.shape_cast %131 : vector<4x1xf32> to vector<1x4x1xf32>
    %cst_48 = arith.constant dense<0.000000e+00> : vector<1xf32>
    %133 = vector.multi_reduction <add>, %132, %cst_48 [1, 2] : vector<1x4x1xf32> to vector<1xf32>
    %134 = vector.shape_cast %133 : vector<1xf32> to vector<1x1x1xf32>
    %135 = vector.extract %134[0, 0, 0] : f32 from vector<1x1x1xf32>
    %136 = vector.broadcast %135 : f32 to vector<1x1xf32>
    %137 = arith.addf %128, %136 : vector<1x1xf32>
    %138 = vector.extract_strided_slice %118 {offsets = [0, 2], sizes = [4, 1], strides = [1, 1]} : vector<4x3xf32> to vector<4x1xf32>
    %139 = vector.extract_strided_slice %1 {offsets = [0, 0], sizes = [4, 1], strides = [1, 1]} : vector<4x512xf32> to vector<4x1xf32>
    %140 = arith.mulf %138, %139 : vector<4x1xf32>
    %141 = vector.shape_cast %140 : vector<4x1xf32> to vector<1x4x1xf32>
    %cst_49 = arith.constant dense<0.000000e+00> : vector<1xf32>
    %142 = vector.multi_reduction <add>, %141, %cst_49 [1, 2] : vector<1x4x1xf32> to vector<1xf32>
    %143 = vector.shape_cast %142 : vector<1xf32> to vector<1x1x1xf32>
    %144 = vector.extract %143[0, 0, 0] : f32 from vector<1x1x1xf32>
    %145 = vector.broadcast %144 : f32 to vector<1x1xf32>
    %146 = arith.addf %137, %145 : vector<1x1xf32>
    %147 = vector.extract_strided_slice %119 {offsets = [0, 0], sizes = [4, 1], strides = [1, 1]} : vector<4x3xf32> to vector<4x1xf32>
    %148 = vector.extract_strided_slice %10 {offsets = [0, 126], sizes = [4, 1], strides = [1, 1]} : vector<4x128xf32> to vector<4x1xf32>
    %149 = arith.mulf %147, %148 : vector<4x1xf32>
    %150 = vector.shape_cast %149 : vector<4x1xf32> to vector<1x4x1xf32>
    %cst_50 = arith.constant dense<0.000000e+00> : vector<1xf32>
    %151 = vector.multi_reduction <add>, %150, %cst_50 [1, 2] : vector<1x4x1xf32> to vector<1xf32>
    %152 = vector.shape_cast %151 : vector<1xf32> to vector<1x1x1xf32>
    %153 = vector.extract %152[0, 0, 0] : f32 from vector<1x1x1xf32>
    %154 = vector.broadcast %153 : f32 to vector<1x1xf32>
    %155 = arith.addf %146, %154 : vector<1x1xf32>
    %156 = vector.extract_strided_slice %119 {offsets = [0, 1], sizes = [4, 1], strides = [1, 1]} : vector<4x3xf32> to vector<4x1xf32>
    %157 = vector.extract_strided_slice %10 {offsets = [0, 127], sizes = [4, 1], strides = [1, 1]} : vector<4x128xf32> to vector<4x1xf32>
    %158 = arith.mulf %156, %157 : vector<4x1xf32>
    %159 = vector.shape_cast %158 : vector<4x1xf32> to vector<1x4x1xf32>
    %cst_51 = arith.constant dense<0.000000e+00> : vector<1xf32>
    %160 = vector.multi_reduction <add>, %159, %cst_51 [1, 2] : vector<1x4x1xf32> to vector<1xf32>
    %161 = vector.shape_cast %160 : vector<1xf32> to vector<1x1x1xf32>
    %162 = vector.extract %161[0, 0, 0] : f32 from vector<1x1x1xf32>
    %163 = vector.broadcast %162 : f32 to vector<1x1xf32>
    %164 = arith.addf %155, %163 : vector<1x1xf32>
    %165 = vector.extract_strided_slice %119 {offsets = [0, 2], sizes = [4, 1], strides = [1, 1]} : vector<4x3xf32> to vector<4x1xf32>
    %166 = vector.extract_strided_slice %3 {offsets = [0, 0], sizes = [4, 1], strides = [1, 1]} : vector<4x512xf32> to vector<4x1xf32>
    %167 = arith.mulf %165, %166 : vector<4x1xf32>
    %168 = vector.shape_cast %167 : vector<4x1xf32> to vector<1x4x1xf32>
    %cst_52 = arith.constant dense<0.000000e+00> : vector<1xf32>
    %169 = vector.multi_reduction <add>, %168, %cst_52 [1, 2] : vector<1x4x1xf32> to vector<1xf32>
    %170 = vector.shape_cast %169 : vector<1xf32> to vector<1x1x1xf32>
    %171 = vector.extract %170[0, 0, 0] : f32 from vector<1x1x1xf32>
    %172 = vector.broadcast %171 : f32 to vector<1x1xf32>
    %173 = arith.addf %164, %172 : vector<1x1xf32>
    %174 = vector.extract_strided_slice %120 {offsets = [0, 0], sizes = [4, 1], strides = [1, 1]} : vector<4x3xf32> to vector<4x1xf32>
    %175 = vector.extract_strided_slice %13 {offsets = [0, 126], sizes = [4, 1], strides = [1, 1]} : vector<4x128xf32> to vector<4x1xf32>
    %176 = arith.mulf %174, %175 : vector<4x1xf32>
    %177 = vector.shape_cast %176 : vector<4x1xf32> to vector<1x4x1xf32>
    %cst_53 = arith.constant dense<0.000000e+00> : vector<1xf32>
    %178 = vector.multi_reduction <add>, %177, %cst_53 [1, 2] : vector<1x4x1xf32> to vector<1xf32>
    %179 = vector.shape_cast %178 : vector<1xf32> to vector<1x1x1xf32>
    %180 = vector.extract %179[0, 0, 0] : f32 from vector<1x1x1xf32>
    %181 = vector.broadcast %180 : f32 to vector<1x1xf32>
    %182 = arith.addf %173, %181 : vector<1x1xf32>
    %183 = vector.extract_strided_slice %120 {offsets = [0, 1], sizes = [4, 1], strides = [1, 1]} : vector<4x3xf32> to vector<4x1xf32>
    %184 = vector.extract_strided_slice %13 {offsets = [0, 127], sizes = [4, 1], strides = [1, 1]} : vector<4x128xf32> to vector<4x1xf32>
    %185 = arith.mulf %183, %184 : vector<4x1xf32>
    %186 = vector.shape_cast %185 : vector<4x1xf32> to vector<1x4x1xf32>
    %cst_54 = arith.constant dense<0.000000e+00> : vector<1xf32>
    %187 = vector.multi_reduction <add>, %186, %cst_54 [1, 2] : vector<1x4x1xf32> to vector<1xf32>
    %188 = vector.shape_cast %187 : vector<1xf32> to vector<1x1x1xf32>
    %189 = vector.extract %188[0, 0, 0] : f32 from vector<1x1x1xf32>
    %190 = vector.broadcast %189 : f32 to vector<1x1xf32>
    %191 = arith.addf %182, %190 : vector<1x1xf32>
    %192 = vector.extract_strided_slice %120 {offsets = [0, 2], sizes = [4, 1], strides = [1, 1]} : vector<4x3xf32> to vector<4x1xf32>
    %193 = vector.extract_strided_slice %4 {offsets = [0, 0], sizes = [4, 1], strides = [1, 1]} : vector<4x512xf32> to vector<4x1xf32>
    %194 = arith.mulf %192, %193 : vector<4x1xf32>
    %195 = vector.shape_cast %194 : vector<4x1xf32> to vector<1x4x1xf32>
    %cst_55 = arith.constant dense<0.000000e+00> : vector<1xf32>
    %196 = vector.multi_reduction <add>, %195, %cst_55 [1, 2] : vector<1x4x1xf32> to vector<1xf32>
    %197 = vector.shape_cast %196 : vector<1xf32> to vector<1x1x1xf32>
    %198 = vector.extract %197[0, 0, 0] : f32 from vector<1x1x1xf32>
    %199 = vector.broadcast %198 : f32 to vector<1x1xf32>
    %200 = arith.addf %191, %199 : vector<1x1xf32>
    %201 = vector.extract_strided_slice %118 {offsets = [0, 0], sizes = [4, 1], strides = [1, 1]} : vector<4x3xf32> to vector<4x1xf32>
    %202 = vector.extract_strided_slice %1 {offsets = [0, 511], sizes = [4, 1], strides = [1, 1]} : vector<4x512xf32> to vector<4x1xf32>
    %203 = arith.mulf %201, %202 : vector<4x1xf32>
    %204 = vector.shape_cast %203 : vector<4x1xf32> to vector<1x4x1xf32>
    %cst_56 = arith.constant dense<0.000000e+00> : vector<1xf32>
    %205 = vector.multi_reduction <add>, %204, %cst_56 [1, 2] : vector<1x4x1xf32> to vector<1xf32>
    %206 = vector.shape_cast %205 : vector<1xf32> to vector<1x1x1xf32>
    %207 = vector.extract %206[0, 0, 0] : f32 from vector<1x1x1xf32>
    %208 = vector.broadcast %207 : f32 to vector<1x1xf32>
    %209 = vector.extract_strided_slice %118 {offsets = [0, 1], sizes = [4, 1], strides = [1, 1]} : vector<4x3xf32> to vector<4x1xf32>
    %210 = vector.extract_strided_slice %8 {offsets = [0, 0], sizes = [4, 1], strides = [1, 1]} : vector<4x128xf32> to vector<4x1xf32>
    %211 = arith.mulf %209, %210 : vector<4x1xf32>
    %212 = vector.shape_cast %211 : vector<4x1xf32> to vector<1x4x1xf32>
    %cst_57 = arith.constant dense<0.000000e+00> : vector<1xf32>
    %213 = vector.multi_reduction <add>, %212, %cst_57 [1, 2] : vector<1x4x1xf32> to vector<1xf32>
    %214 = vector.shape_cast %213 : vector<1xf32> to vector<1x1x1xf32>
    %215 = vector.extract %214[0, 0, 0] : f32 from vector<1x1x1xf32>
    %216 = vector.broadcast %215 : f32 to vector<1x1xf32>
    %217 = arith.addf %208, %216 : vector<1x1xf32>
    %218 = vector.extract_strided_slice %118 {offsets = [0, 2], sizes = [4, 1], strides = [1, 1]} : vector<4x3xf32> to vector<4x1xf32>
    %219 = vector.extract_strided_slice %8 {offsets = [0, 1], sizes = [4, 1], strides = [1, 1]} : vector<4x128xf32> to vector<4x1xf32>
    %220 = arith.mulf %218, %219 : vector<4x1xf32>
    %221 = vector.shape_cast %220 : vector<4x1xf32> to vector<1x4x1xf32>
    %cst_58 = arith.constant dense<0.000000e+00> : vector<1xf32>
    %222 = vector.multi_reduction <add>, %221, %cst_58 [1, 2] : vector<1x4x1xf32> to vector<1xf32>
    %223 = vector.shape_cast %222 : vector<1xf32> to vector<1x1x1xf32>
    %224 = vector.extract %223[0, 0, 0] : f32 from vector<1x1x1xf32>
    %225 = vector.broadcast %224 : f32 to vector<1x1xf32>
    %226 = arith.addf %217, %225 : vector<1x1xf32>
    %227 = vector.extract_strided_slice %119 {offsets = [0, 0], sizes = [4, 1], strides = [1, 1]} : vector<4x3xf32> to vector<4x1xf32>
    %228 = vector.extract_strided_slice %3 {offsets = [0, 511], sizes = [4, 1], strides = [1, 1]} : vector<4x512xf32> to vector<4x1xf32>
    %229 = arith.mulf %227, %228 : vector<4x1xf32>
    %230 = vector.shape_cast %229 : vector<4x1xf32> to vector<1x4x1xf32>
    %cst_59 = arith.constant dense<0.000000e+00> : vector<1xf32>
    %231 = vector.multi_reduction <add>, %230, %cst_59 [1, 2] : vector<1x4x1xf32> to vector<1xf32>
    %232 = vector.shape_cast %231 : vector<1xf32> to vector<1x1x1xf32>
    %233 = vector.extract %232[0, 0, 0] : f32 from vector<1x1x1xf32>
    %234 = vector.broadcast %233 : f32 to vector<1x1xf32>
    %235 = arith.addf %226, %234 : vector<1x1xf32>
    %236 = vector.extract_strided_slice %119 {offsets = [0, 1], sizes = [4, 1], strides = [1, 1]} : vector<4x3xf32> to vector<4x1xf32>
    %237 = vector.extract_strided_slice %12 {offsets = [0, 0], sizes = [4, 1], strides = [1, 1]} : vector<4x128xf32> to vector<4x1xf32>
    %238 = arith.mulf %236, %237 : vector<4x1xf32>
    %239 = vector.shape_cast %238 : vector<4x1xf32> to vector<1x4x1xf32>
    %cst_60 = arith.constant dense<0.000000e+00> : vector<1xf32>
    %240 = vector.multi_reduction <add>, %239, %cst_60 [1, 2] : vector<1x4x1xf32> to vector<1xf32>
    %241 = vector.shape_cast %240 : vector<1xf32> to vector<1x1x1xf32>
    %242 = vector.extract %241[0, 0, 0] : f32 from vector<1x1x1xf32>
    %243 = vector.broadcast %242 : f32 to vector<1x1xf32>
    %244 = arith.addf %235, %243 : vector<1x1xf32>
    %245 = vector.extract_strided_slice %119 {offsets = [0, 2], sizes = [4, 1], strides = [1, 1]} : vector<4x3xf32> to vector<4x1xf32>
    %246 = vector.extract_strided_slice %12 {offsets = [0, 1], sizes = [4, 1], strides = [1, 1]} : vector<4x128xf32> to vector<4x1xf32>
    %247 = arith.mulf %245, %246 : vector<4x1xf32>
    %248 = vector.shape_cast %247 : vector<4x1xf32> to vector<1x4x1xf32>
    %cst_61 = arith.constant dense<0.000000e+00> : vector<1xf32>
    %249 = vector.multi_reduction <add>, %248, %cst_61 [1, 2] : vector<1x4x1xf32> to vector<1xf32>
    %250 = vector.shape_cast %249 : vector<1xf32> to vector<1x1x1xf32>
    %251 = vector.extract %250[0, 0, 0] : f32 from vector<1x1x1xf32>
    %252 = vector.broadcast %251 : f32 to vector<1x1xf32>
    %253 = arith.addf %244, %252 : vector<1x1xf32>
    %254 = vector.extract_strided_slice %120 {offsets = [0, 0], sizes = [4, 1], strides = [1, 1]} : vector<4x3xf32> to vector<4x1xf32>
    %255 = vector.extract_strided_slice %4 {offsets = [0, 511], sizes = [4, 1], strides = [1, 1]} : vector<4x512xf32> to vector<4x1xf32>
    %256 = arith.mulf %254, %255 : vector<4x1xf32>
    %257 = vector.shape_cast %256 : vector<4x1xf32> to vector<1x4x1xf32>
    %cst_62 = arith.constant dense<0.000000e+00> : vector<1xf32>
    %258 = vector.multi_reduction <add>, %257, %cst_62 [1, 2] : vector<1x4x1xf32> to vector<1xf32>
    %259 = vector.shape_cast %258 : vector<1xf32> to vector<1x1x1xf32>
    %260 = vector.extract %259[0, 0, 0] : f32 from vector<1x1x1xf32>
    %261 = vector.broadcast %260 : f32 to vector<1x1xf32>
    %262 = arith.addf %253, %261 : vector<1x1xf32>
    %263 = vector.extract_strided_slice %120 {offsets = [0, 1], sizes = [4, 1], strides = [1, 1]} : vector<4x3xf32> to vector<4x1xf32>
    %264 = vector.extract_strided_slice %14 {offsets = [0, 0], sizes = [4, 1], strides = [1, 1]} : vector<4x128xf32> to vector<4x1xf32>
    %265 = arith.mulf %263, %264 : vector<4x1xf32>
    %266 = vector.shape_cast %265 : vector<4x1xf32> to vector<1x4x1xf32>
    %cst_63 = arith.constant dense<0.000000e+00> : vector<1xf32>
    %267 = vector.multi_reduction <add>, %266, %cst_63 [1, 2] : vector<1x4x1xf32> to vector<1xf32>
    %268 = vector.shape_cast %267 : vector<1xf32> to vector<1x1x1xf32>
    %269 = vector.extract %268[0, 0, 0] : f32 from vector<1x1x1xf32>
    %270 = vector.broadcast %269 : f32 to vector<1x1xf32>
    %271 = arith.addf %262, %270 : vector<1x1xf32>
    %272 = vector.extract_strided_slice %120 {offsets = [0, 2], sizes = [4, 1], strides = [1, 1]} : vector<4x3xf32> to vector<4x1xf32>
    %273 = vector.extract_strided_slice %14 {offsets = [0, 1], sizes = [4, 1], strides = [1, 1]} : vector<4x128xf32> to vector<4x1xf32>
    %274 = arith.mulf %272, %273 : vector<4x1xf32>
    %275 = vector.shape_cast %274 : vector<4x1xf32> to vector<1x4x1xf32>
    %cst_64 = arith.constant dense<0.000000e+00> : vector<1xf32>
    %276 = vector.multi_reduction <add>, %275, %cst_64 [1, 2] : vector<1x4x1xf32> to vector<1xf32>
    %277 = vector.shape_cast %276 : vector<1xf32> to vector<1x1x1xf32>
    %278 = vector.extract %277[0, 0, 0] : f32 from vector<1x1x1xf32>
    %279 = vector.broadcast %278 : f32 to vector<1x1xf32>
    %280 = arith.addf %271, %279 : vector<1x1xf32>
    %281 = arith.negf %200 : vector<1x1xf32>
    %282 = math.exp %281 : vector<1x1xf32>
    %cst_65 = arith.constant 1.000000e+00 : f32
    %283 = vector.broadcast %cst_65 : f32 to vector<1x1xf32>
    %284 = arith.addf %283, %282 : vector<1x1xf32>
    %285 = arith.divf %283, %284 : vector<1x1xf32>
    %286 = arith.negf %280 : vector<1x1xf32>
    %287 = math.exp %286 : vector<1x1xf32>
    %cst_66 = arith.constant 1.000000e+00 : f32
    %288 = vector.broadcast %cst_66 : f32 to vector<1x1xf32>
    %289 = arith.addf %288, %287 : vector<1x1xf32>
    %290 = arith.divf %288, %289 : vector<1x1xf32>
    %291 = vector.broadcast %115 : vector<1x512xf32> to vector<4x512xf32>
    %292 = arith.mulf %291, %3 : vector<4x512xf32>
    %293 = vector.broadcast %115 : vector<1x512xf32> to vector<4x512xf32>
    %294 = arith.mulf %293, %4 : vector<4x512xf32>
    %c0_67 = arith.constant 0 : index
    %c0_68 = arith.constant 0 : index
    %295 = vector.load %arg14[%c0_67, %c0_68] : memref<4x12xf32, #tpu.memory_space<vmem>>, vector<4x12xf32>
    %296 = vector.extract_strided_slice %292 {offsets = [0, 0], sizes = [4, 1], strides = [1, 1]} : vector<4x512xf32> to vector<4x1xf32>
    %297 = vector.extract_strided_slice %10 {offsets = [0, 127], sizes = [4, 1], strides = [1, 1]} : vector<4x128xf32> to vector<4x1xf32>
    %298 = vector.broadcast %285 : vector<1x1xf32> to vector<4x1xf32>
    %299 = arith.mulf %298, %297 : vector<4x1xf32>
    %300 = arith.select %15, %296, %299 : vector<4x1xf32>
    %c1_i32_69 = arith.constant 1 : i32
    %301 = tpu.dynamic_rotate %292 by %c1_i32_69 dim 1 : vector<4x512xf32>, i32 -> vector<4x512xf32>
    %302 = vector.shape_cast %19 : vector<1x512xi1> to vector<1x512xi1>
    %303 = vector.broadcast %302 : vector<1x512xi1> to vector<4x512xi1>
    %304 = vector.shape_cast %300 : vector<4x1xf32> to vector<4x1xf32>
    %305 = vector.broadcast %304 : vector<4x1xf32> to vector<4x512xf32>
    %306 = arith.select %303, %305, %301 : vector<4x512xi1>, vector<4x512xf32>
    %307 = vector.extract_strided_slice %292 {offsets = [0, 511], sizes = [4, 1], strides = [1, 1]} : vector<4x512xf32> to vector<4x1xf32>
    %308 = vector.extract_strided_slice %12 {offsets = [0, 0], sizes = [4, 1], strides = [1, 1]} : vector<4x128xf32> to vector<4x1xf32>
    %309 = vector.broadcast %290 : vector<1x1xf32> to vector<4x1xf32>
    %310 = arith.mulf %309, %308 : vector<4x1xf32>
    %311 = arith.select %16, %307, %310 : vector<4x1xf32>
    %c511_i32_70 = arith.constant 511 : i32
    %312 = tpu.dynamic_rotate %292 by %c511_i32_70 dim 1 : vector<4x512xf32>, i32 -> vector<4x512xf32>
    %313 = vector.shape_cast %21 : vector<1x512xi1> to vector<1x512xi1>
    %314 = vector.broadcast %313 : vector<1x512xi1> to vector<4x512xi1>
    %315 = vector.shape_cast %311 : vector<4x1xf32> to vector<4x1xf32>
    %316 = vector.broadcast %315 : vector<4x1xf32> to vector<4x512xf32>
    %317 = arith.select %314, %316, %312 : vector<4x512xi1>, vector<4x512xf32>
    %318 = vector.extract_strided_slice %295 {offsets = [0, 0], sizes = [4, 4], strides = [1, 1]} : vector<4x12xf32> to vector<4x4xf32>
    %cst_71 = arith.constant dense<0.000000e+00> : vector<4x512xf32>
    %319 = tpu.matmul %318, %306, %cst_71 {dimension_numbers = #tpu.dot_dimension_numbers<[1], [0], [0], [1], [0, 0, 1, 1], [], []>} : vector<4x4xf32>, vector<4x512xf32>, vector<4x512xf32> -> vector<4x512xf32>
    %320 = vector.extract_strided_slice %295 {offsets = [0, 4], sizes = [4, 4], strides = [1, 1]} : vector<4x12xf32> to vector<4x4xf32>
    %cst_72 = arith.constant dense<0.000000e+00> : vector<4x512xf32>
    %321 = tpu.matmul %320, %292, %cst_72 {dimension_numbers = #tpu.dot_dimension_numbers<[1], [0], [0], [1], [0, 0, 1, 1], [], []>} : vector<4x4xf32>, vector<4x512xf32>, vector<4x512xf32> -> vector<4x512xf32>
    %322 = arith.addf %319, %321 : vector<4x512xf32>
    %323 = vector.extract_strided_slice %295 {offsets = [0, 8], sizes = [4, 4], strides = [1, 1]} : vector<4x12xf32> to vector<4x4xf32>
    %cst_73 = arith.constant dense<0.000000e+00> : vector<4x512xf32>
    %324 = tpu.matmul %323, %317, %cst_73 {dimension_numbers = #tpu.dot_dimension_numbers<[1], [0], [0], [1], [0, 0, 1, 1], [], []>} : vector<4x4xf32>, vector<4x512xf32>, vector<4x512xf32> -> vector<4x512xf32>
    %325 = arith.addf %322, %324 : vector<4x512xf32>
    %c0_74 = arith.constant 0 : index
    %c0_75 = arith.constant 0 : index
    %326 = vector.load %arg15[%c0_74, %c0_75] : memref<4x12xf32, #tpu.memory_space<vmem>>, vector<4x12xf32>
    %327 = vector.extract_strided_slice %294 {offsets = [0, 0], sizes = [4, 1], strides = [1, 1]} : vector<4x512xf32> to vector<4x1xf32>
    %328 = vector.extract_strided_slice %13 {offsets = [0, 127], sizes = [4, 1], strides = [1, 1]} : vector<4x128xf32> to vector<4x1xf32>
    %329 = vector.broadcast %285 : vector<1x1xf32> to vector<4x1xf32>
    %330 = arith.mulf %329, %328 : vector<4x1xf32>
    %331 = arith.select %15, %327, %330 : vector<4x1xf32>
    %c1_i32_76 = arith.constant 1 : i32
    %332 = tpu.dynamic_rotate %294 by %c1_i32_76 dim 1 : vector<4x512xf32>, i32 -> vector<4x512xf32>
    %333 = vector.shape_cast %19 : vector<1x512xi1> to vector<1x512xi1>
    %334 = vector.broadcast %333 : vector<1x512xi1> to vector<4x512xi1>
    %335 = vector.shape_cast %331 : vector<4x1xf32> to vector<4x1xf32>
    %336 = vector.broadcast %335 : vector<4x1xf32> to vector<4x512xf32>
    %337 = arith.select %334, %336, %332 : vector<4x512xi1>, vector<4x512xf32>
    %338 = vector.extract_strided_slice %294 {offsets = [0, 511], sizes = [4, 1], strides = [1, 1]} : vector<4x512xf32> to vector<4x1xf32>
    %339 = vector.extract_strided_slice %14 {offsets = [0, 0], sizes = [4, 1], strides = [1, 1]} : vector<4x128xf32> to vector<4x1xf32>
    %340 = vector.broadcast %290 : vector<1x1xf32> to vector<4x1xf32>
    %341 = arith.mulf %340, %339 : vector<4x1xf32>
    %342 = arith.select %16, %338, %341 : vector<4x1xf32>
    %c511_i32_77 = arith.constant 511 : i32
    %343 = tpu.dynamic_rotate %294 by %c511_i32_77 dim 1 : vector<4x512xf32>, i32 -> vector<4x512xf32>
    %344 = vector.shape_cast %21 : vector<1x512xi1> to vector<1x512xi1>
    %345 = vector.broadcast %344 : vector<1x512xi1> to vector<4x512xi1>
    %346 = vector.shape_cast %342 : vector<4x1xf32> to vector<4x1xf32>
    %347 = vector.broadcast %346 : vector<4x1xf32> to vector<4x512xf32>
    %348 = arith.select %345, %347, %343 : vector<4x512xi1>, vector<4x512xf32>
    %349 = vector.extract_strided_slice %326 {offsets = [0, 0], sizes = [4, 4], strides = [1, 1]} : vector<4x12xf32> to vector<4x4xf32>
    %cst_78 = arith.constant dense<0.000000e+00> : vector<4x512xf32>
    %350 = tpu.matmul %349, %337, %cst_78 {dimension_numbers = #tpu.dot_dimension_numbers<[1], [0], [0], [1], [0, 0, 1, 1], [], []>} : vector<4x4xf32>, vector<4x512xf32>, vector<4x512xf32> -> vector<4x512xf32>
    %351 = vector.extract_strided_slice %326 {offsets = [0, 4], sizes = [4, 4], strides = [1, 1]} : vector<4x12xf32> to vector<4x4xf32>
    %cst_79 = arith.constant dense<0.000000e+00> : vector<4x512xf32>
    %352 = tpu.matmul %351, %294, %cst_79 {dimension_numbers = #tpu.dot_dimension_numbers<[1], [0], [0], [1], [0, 0, 1, 1], [], []>} : vector<4x4xf32>, vector<4x512xf32>, vector<4x512xf32> -> vector<4x512xf32>
    %353 = arith.addf %350, %352 : vector<4x512xf32>
    %354 = vector.extract_strided_slice %326 {offsets = [0, 8], sizes = [4, 4], strides = [1, 1]} : vector<4x12xf32> to vector<4x4xf32>
    %cst_80 = arith.constant dense<0.000000e+00> : vector<4x512xf32>
    %355 = tpu.matmul %354, %348, %cst_80 {dimension_numbers = #tpu.dot_dimension_numbers<[1], [0], [0], [1], [0, 0, 1, 1], [], []>} : vector<4x4xf32>, vector<4x512xf32>, vector<4x512xf32> -> vector<4x512xf32>
    %356 = arith.addf %353, %355 : vector<4x512xf32>
    %357 = arith.addf %325, %356 : vector<4x512xf32>
    %358 = arith.addf %105, %357 : vector<4x512xf32>
    %cst_81 = arith.constant 0.000000e+00 : f32
    %359 = vector.broadcast %cst_81 : f32 to vector<4x512xf32>
    %360 = arith.maximumf %358, %359 : vector<4x512xf32>
    %cst_82 = arith.constant 1.000000e+00 : f32
    %361 = vector.broadcast %cst_82 : f32 to vector<1x512xf32>
    %362 = arith.subf %361, %116 : vector<1x512xf32>
    %363 = vector.broadcast %362 : vector<1x512xf32> to vector<4x512xf32>
    %364 = arith.mulf %363, %3 : vector<4x512xf32>
    %365 = vector.broadcast %116 : vector<1x512xf32> to vector<4x512xf32>
    %366 = arith.mulf %365, %360 : vector<4x512xf32>
    %367 = arith.addf %364, %366 : vector<4x512xf32>
    %c0_83 = arith.constant 0 : index
    %c0_84 = arith.constant 0 : index
    %c0_85 = arith.constant 0 : index
    %368 = vector.load %arg17[%c0_83, %c0_84, %c0_85] : memref<1x4x512xf32, #tpu.memory_space<vmem>>, vector<1x4x512xf32>
    %369 = vector.shape_cast %368 : vector<1x4x512xf32> to vector<4x512xf32>
    %370 = vector.shape_cast %367 : vector<4x512xf32> to vector<1x4x512xf32>
    tpu.vector_store %arg17[%c0_83, %c0_84, %c0_85], %370 {strides = array<i32>} : memref<1x4x512xf32, #tpu.memory_space<vmem>>, vector<1x4x512xf32>,
    return
  }
  func.func @transform_0(%arg0: i32, %arg1: i32) -> (i32, i32, i32) {
    %c0_i32 = arith.constant 0 : i32
    %c0_i32_0 = arith.constant 0 : i32
    return %arg0, %c0_i32, %arg1 : i32, i32, i32
  }
  func.func @transform_1(%arg0: i32, %arg1: i32) -> (i32, i32, i32) {
    %c0_i32 = arith.constant 0 : i32
    %c0_i32_0 = arith.constant 0 : i32
    return %arg0, %c0_i32, %arg1 : i32, i32, i32
  }
  func.func @transform_2(%arg0: i32, %arg1: i32) -> (i32, i32) {
    %c0_i32 = arith.constant 0 : i32
    %c0_i32_0 = arith.constant 0 : i32
    return %c0_i32, %arg1 : i32, i32
  }
  func.func @transform_3(%arg0: i32, %arg1: i32) -> (i32, i32, i32) {
    %c4_i32 = arith.constant 4 : i32
    %0 = arith.muli %arg1, %c4_i32 : i32
    %c1_i32 = arith.constant 1 : i32
    %1 = arith.subi %0, %c1_i32 : i32
    %c0_i32 = arith.constant 0 : i32
    %2 = arith.maxsi %1, %c0_i32 : i32
    %c0_i32_0 = arith.constant 0 : i32
    %c0_i32_1 = arith.constant 0 : i32
    return %arg0, %c0_i32_0, %2 : i32, i32, i32
  }
  func.func @transform_4(%arg0: i32, %arg1: i32) -> (i32, i32, i32) {
    %c1_i32 = arith.constant 1 : i32
    %0 = arith.addi %arg1, %c1_i32 : i32
    %c4_i32 = arith.constant 4 : i32
    %1 = arith.muli %0, %c4_i32 : i32
    %c3_i32 = arith.constant 3 : i32
    %2 = arith.minsi %1, %c3_i32 : i32
    %c0_i32 = arith.constant 0 : i32
    %c0_i32_0 = arith.constant 0 : i32
    return %arg0, %c0_i32, %2 : i32, i32, i32
  }
  func.func @transform_5(%arg0: i32, %arg1: i32) -> (i32, i32, i32) {
    %c4_i32 = arith.constant 4 : i32
    %0 = arith.muli %arg1, %c4_i32 : i32
    %c1_i32 = arith.constant 1 : i32
    %1 = arith.subi %0, %c1_i32 : i32
    %c0_i32 = arith.constant 0 : i32
    %2 = arith.maxsi %1, %c0_i32 : i32
    %c0_i32_0 = arith.constant 0 : i32
    %c0_i32_1 = arith.constant 0 : i32
    return %arg0, %c0_i32_0, %2 : i32, i32, i32
  }
  func.func @transform_6(%arg0: i32, %arg1: i32) -> (i32, i32, i32) {
    %c1_i32 = arith.constant 1 : i32
    %0 = arith.addi %arg1, %c1_i32 : i32
    %c4_i32 = arith.constant 4 : i32
    %1 = arith.muli %0, %c4_i32 : i32
    %c3_i32 = arith.constant 3 : i32
    %2 = arith.minsi %1, %c3_i32 : i32
    %c0_i32 = arith.constant 0 : i32
    %c0_i32_0 = arith.constant 0 : i32
    return %arg0, %c0_i32, %2 : i32, i32, i32
  }
  func.func @transform_7(%arg0: i32, %arg1: i32) -> (i32, i32) {
    %c4_i32 = arith.constant 4 : i32
    %0 = arith.muli %arg1, %c4_i32 : i32
    %c1_i32 = arith.constant 1 : i32
    %1 = arith.subi %0, %c1_i32 : i32
    %c0_i32 = arith.constant 0 : i32
    %2 = arith.maxsi %1, %c0_i32 : i32
    %c0_i32_0 = arith.constant 0 : i32
    %c0_i32_1 = arith.constant 0 : i32
    return %c0_i32_0, %2 : i32, i32
  }
  func.func @transform_8(%arg0: i32, %arg1: i32) -> (i32, i32) {
    %c1_i32 = arith.constant 1 : i32
    %0 = arith.addi %arg1, %c1_i32 : i32
    %c4_i32 = arith.constant 4 : i32
    %1 = arith.muli %0, %c4_i32 : i32
    %c3_i32 = arith.constant 3 : i32
    %2 = arith.minsi %1, %c3_i32 : i32
    %c0_i32 = arith.constant 0 : i32
    %c0_i32_0 = arith.constant 0 : i32
    return %c0_i32, %2 : i32, i32
  }
  func.func @transform_9(%arg0: i32, %arg1: i32) -> (i32, i32) {
    %c0_i32 = arith.constant 0 : i32
    %c0_i32_0 = arith.constant 0 : i32
    %c0_i32_1 = arith.constant 0 : i32
    return %c0_i32, %c0_i32_0 : i32, i32
  }
  func.func @transform_10(%arg0: i32, %arg1: i32) -> (i32, i32) {
    %c0_i32 = arith.constant 0 : i32
    %c0_i32_0 = arith.constant 0 : i32
    %c0_i32_1 = arith.constant 0 : i32
    return %c0_i32, %c0_i32_0 : i32, i32
  }
  func.func @transform_11(%arg0: i32, %arg1: i32) -> (i32, i32) {
    %c0_i32 = arith.constant 0 : i32
    %c0_i32_0 = arith.constant 0 : i32
    %c0_i32_1 = arith.constant 0 : i32
    return %c0_i32, %c0_i32_0 : i32, i32
  }
  func.func @transform_12(%arg0: i32, %arg1: i32) -> (i32, i32) {
    %c0_i32 = arith.constant 0 : i32
    %c0_i32_0 = arith.constant 0 : i32
    %c0_i32_1 = arith.constant 0 : i32
    return %c0_i32, %c0_i32_0 : i32, i32
  }
  func.func @transform_13(%arg0: i32, %arg1: i32) -> (i32, i32) {
    %c0_i32 = arith.constant 0 : i32
    %c0_i32_0 = arith.constant 0 : i32
    %c0_i32_1 = arith.constant 0 : i32
    return %c0_i32, %c0_i32_0 : i32, i32
  }
  func.func @transform_14(%arg0: i32, %arg1: i32) -> (i32, i32) {
    %c0_i32 = arith.constant 0 : i32
    %c0_i32_0 = arith.constant 0 : i32
    %c0_i32_1 = arith.constant 0 : i32
    return %c0_i32, %c0_i32_0 : i32, i32
  }
  func.func @transform_15(%arg0: i32, %arg1: i32) -> (i32, i32, i32) {
    %c0_i32 = arith.constant 0 : i32
    %c0_i32_0 = arith.constant 0 : i32
    return %arg0, %c0_i32, %arg1 : i32, i32, i32
  }
}

</mosaic_0001>

<bundles_post_ra>
// kernel: tpu_custom_call.1
= control target key start
LH: loop header
LB: loop body
LE: loop exit
PB: predicated region body
PF: predicated region fallthrough
CT: control target
= control target key end

     0   :  { %20 = vsyncpa [#allocation3], 0  ;;  %s3922_s0 = inlined_call_operand.vmem [shape: f32[1,4,512], index: 0, kind: input, shape index: {}]   ;;  %s3923_s1 = inlined_call_operand.hbm [shape: f32[1,4,512], index: 1, kind: input, shape index: {}]   ;;  %s3924_s2 = inlined_call_operand.hbm [shape: f32[4,512], index: 2, kind: input, shape index: {}]   ;;  %s3925_s3 = inlined_call_operand.hbm [shape: f32[1,4,512], index: 3, kind: input, shape index: {}]   ;;  %s3926_s4 = inlined_call_operand.hbm [shape: f32[1,4,512], index: 4, kind: input, shape index: {}]   ;;  %s3927_s5 = inlined_call_operand.hbm [shape: f32[1,4,512], index: 5, kind: input, shape index: {}]   ;;  %s3928_s6 = inlined_call_operand.hbm [shape: f32[1,4,512], index: 6, kind: input, shape index: {}]   ;;  %s3929_s7 = inlined_call_operand.hbm [shape: f32[4,512], index: 7, kind: input, shape index: {}]   ;;  %s3930_s8 = inlined_call_operand.hbm [shape: f32[4,512], index: 8, kind: input, shape index: {}]   ;;  %s3931_s9 = inlined_call_operand.hbm [shape: f32[6,12], index: 9, kind: input, shape index: {}]   ;;  %s3932_s10 = inlined_call_operand.hbm [shape: f32[2,12], index: 10, kind: input, shape index: {}]   ;;  %s3933_s11 = inlined_call_operand.hbm [shape: f32[6,12], index: 11, kind: input, shape index: {}]   ;;  %s3934_s12 = inlined_call_operand.vmem [shape: f32[4,12], index: 12, kind: input, shape index: {}]   ;;  %s3935_s13 = inlined_call_operand.vmem [shape: f32[4,12], index: 13, kind: input, shape index: {}]   ;;  %s3936_s14 = inlined_call_operand.vmem [shape: f32[12,3], index: 14, kind: input, shape index: {}]   ;;  %s3937_s15 = inlined_call_operand.hbm [shape: f32[1,4,512], index: 15, kind: output, shape index: {}]  }
   0x1   :  { %21 = vsyncpa [#allocation6], 0 }
   0x2   :  { %22 = vsyncpa [#allocation9], 0 }
   0x3   :  { %23 = vsyncpa [#allocation12], 0 }
   0x4   :  { %24 = vsyncpa [#allocation15], 0 }
   0x5   :  { %25 = vsyncpa [#allocation18], 0  ;;  %s45_s20 = sshll.u32 %s3924_s2, 4  ;;  %s46_s20 = int_to_ptr.hbm [resolvable:$true] %s45_s20 }
   0x6   :  { %26 = vsyncpa [#allocation4], 0  ;;  %s3281_s21 = smov [#allocation5]   ;;  %s77_s24 = scalar_lea.hbm %s3926_s4, 12 }
   0x7   :  { %s47_s22 = sshll.u32 %s3281_s21, 4  ;;  %s79_s25 = sshll.u32 %s77_s24, 4  ;;  %s48_s22 = int_to_ptr.vmem [resolvable:$true] %s47_s22  ;;  %s80_s25 = int_to_ptr.hbm [resolvable:$true] %s79_s25 }
   0x8   :  { %50 = dma.hbm_to_vmem [thread:$0]  %s46_s20, 256, %s48_s22, [#allocation6]  }
   0x9   :  { %s3282_s26 = smov [#allocation8]   ;;  %s111_s30 = scalar_lea.hbm %s3928_s6, 12 }
   0xa   :  { %s81_s27 = sshll.u32 %s3282_s26, 4  ;;  %s113_s2 = sshll.u32 %s111_s30, 4  ;;  %s82_s27 = int_to_ptr.vmem [resolvable:$true] %s81_s27  ;;  %s114_s2 = int_to_ptr.hbm [resolvable:$true] %s113_s2 }
   0xb   :  { %84 = dma.hbm_to_vmem [thread:$0]  %s80_s25, 64, %s82_s27, [#allocation9]  }
   0xc   :  { %s3283_s16 = smov [#allocation11]   ;;  %s145_s4 = scalar_lea.hbm %s3930_s8, 12 }
   0xd   :  { %s115_s17 = sshll.u32 %s3283_s16, 4  ;;  %s147_s20 = sshll.u32 %s145_s4, 4  ;;  %s116_s17 = int_to_ptr.vmem [resolvable:$true] %s115_s17  ;;  %s148_s20 = int_to_ptr.hbm [resolvable:$true] %s147_s20 }
   0xe   :  { %118 = dma.hbm_to_vmem [thread:$0]  %s114_s2, 64, %s116_s17, [#allocation12]  }
   0xf   :  { %s3284_s21 = smov [#allocation14]   ;;  %s169_s6 = sshll.u32 %s3932_s10, 4  ;;  %s170_s6 = int_to_ptr.hbm [resolvable:$true] %s169_s6 }
  0x10   :  { %s149_s22 = sshll.u32 %s3284_s21, 4  ;;  %s3285_s24 = smov [#allocation17]   ;;  %s150_s22 = int_to_ptr.vmem [resolvable:$true] %s149_s22 }
  0x11   :  { %152 = dma.hbm_to_vmem [thread:$0]  %s148_s20, 64, %s150_s22, [#allocation15]  }
  0x12   :  { %s171_s25 = sshll.u32 %s3285_s24, 4  ;;  %s34_s28 = sshll.u32 %s3923_s1, 4  ;;  %s172_s25 = int_to_ptr.vmem [resolvable:$true] %s171_s25  ;;  %s35_s28 = int_to_ptr.hbm [resolvable:$true] %s34_s28 }
  0x13   :  { %174 = dma.hbm_to_vmem [thread:$0]  %s170_s6, 32, %s172_s25, [#allocation18]  }
  0x14   :  { %s62_s30 = sshll.u32 %s3925_s3, 4  ;;  %s3286_s2 = smov [#allocation2]   ;;  %s63_s30 = int_to_ptr.hbm [resolvable:$true] %s62_s30 }
  0x15   :  { %s36_s16 = sshll.u32 %s3286_s2, 4  ;;  %s3287_s10 = smov [#allocation7]   ;;  %s37_s16 = int_to_ptr.vmem [resolvable:$true] %s36_s16 }
  0x16   :  { %39 = dma.hbm_to_vmem [thread:$0]  %s35_s28, 256, %s37_s16, [#allocation3]  }
  0x17   :  { %s64_s17 = sshll.u32 %s3287_s10, 4  ;;  %s96_s4 = sshll.u32 %s3927_s5, 4  ;;  %s65_s17 = int_to_ptr.vmem [resolvable:$true] %s64_s17  ;;  %s97_s4 = int_to_ptr.hbm [resolvable:$true] %s96_s4 }
  0x18   :  { %67 = dma.hbm_to_vmem [thread:$0]  %s63_s30, 64, %s65_s17, [#allocation6]  }
  0x19   :  { %s130_s21 = sshll.u32 %s3929_s7, 4  ;;  %s3288_s22 = smov [#allocation10]   ;;  %s131_s21 = int_to_ptr.hbm [resolvable:$true] %s130_s21 }
  0x1a   :  { %s98_s3 = sshll.u32 %s3288_s22, 4  ;;  %s3289_s23 = smov [#allocation13]   ;;  %s99_s3 = int_to_ptr.vmem [resolvable:$true] %s98_s3 }
  0x1b   :  { %101 = dma.hbm_to_vmem [thread:$0]  %s97_s4, 64, %s99_s3, [#allocation9]  }
  0x1c   :  { %s132_s14 = sshll.u32 %s3289_s23, 4  ;;  %s158_s25 = sshll.u32 %s3931_s9, 4  ;;  %s133_s14 = int_to_ptr.vmem [resolvable:$true] %s132_s14  ;;  %s159_s25 = int_to_ptr.hbm [resolvable:$true] %s158_s25 }
  0x1d   :  { %135 = dma.hbm_to_vmem [thread:$0]  %s131_s21, 64, %s133_s14, [#allocation12]  }
  0x1e   :  { %s180_s27 = sshll.u32 %s3933_s11, 4  ;;  %s3290_s28 = smov [#allocation16]   ;;  %s181_s27 = int_to_ptr.hbm [resolvable:$true] %s180_s27 }
  0x1f   :  { %s160_s7 = sshll.u32 %s3290_s28, 4  ;;  %s3291_s8 = smov [#allocation19]   ;;  %s161_s7 = int_to_ptr.vmem [resolvable:$true] %s160_s7 }
  0x20   :  { %163 = dma.hbm_to_vmem [thread:$0]  %s159_s25, 128, %s161_s7, [#allocation15]  }
  0x21   :  { %s182_s29 = sshll.u32 %s3291_s8, 4  ;;  %s183_s29 = int_to_ptr.vmem [resolvable:$true] %s182_s29 }
  0x22   :  { %185 = dma.hbm_to_vmem [thread:$0]  %s181_s27, 128, %s183_s29, [#allocation18]  }
  0x23   :  { %3267 = dma.done.wait [#allocation3], 256  }
  0x24   :  { %3268 = vsyncadd [#allocation3], 4294967040 }
  0x25   :  { %3269 = dma.done.wait [#allocation6], 320  }
  0x26   :  { %3270 = vsyncadd [#allocation6], 4294966976 }
  0x27   :  { %3271 = dma.done.wait [#allocation9], 128  }
  0x28   :  { %3272 = vsyncadd [#allocation9], 4294967168 }
  0x29   :  { %3273 = dma.done.wait [#allocation12], 128  }
  0x2a   :  { %3274 = vsyncadd [#allocation12], 4294967168 }
  0x2b   :  { %3275 = dma.done.wait [#allocation15], 192  }
  0x2c   :  { %3276 = vsyncadd [#allocation15], 4294967104 }
  0x2d   :  { %3277 = dma.done.wait [#allocation18], 160  }
  0x2e   :  { %3278 = vsyncadd [#allocation18], 4294967136  ;;  %v3292_v0 = vmov 0   ;;  %v3419_v1 = vld [vmem:[%s3922_s0 + $0x8] sm:$0xff]  ;;  %v3424_v2 = vld [vmem:[%s3922_s0] sm:$0xff]  ;;  %s3293_s16 = smov 1   ;;  %v273_v58 = vlaneseq }
  0x2f   :  { %2956 = vset.pattern.permute.xlu1 %v3292_v0  ;;  %2958 = vset.pattern.permute.xlu0 %v3292_v0  ;;  %298 = vst [vmem:[#allocation1 + $0x10] ss:$2 sm:$0xff] %v3419_v1  ;;  %v3430_v3 = vld [vmem:[#allocation5 + $0x8] sm:$0xff]  ;;  %v3435_v4 = vld [vmem:[#allocation2 + $0x8] sm:$0xff]  ;;  %v3439_v5 = vld [vmem:[#allocation2] sm:$0xff]  ;;  %s3295_s0 = smov 127  }
  0x30   :  { %2957 = vset.pattern.permute.xlu2 %v3292_v0  ;;  %353 = vrot.lane.b32.xlu0 %v3419_v1, %s3293_s16  ;;  %296 = vst [vmem:[#allocation1] ss:$2 sm:$0xff] %v3424_v2  ;;  %v3294_v8 = vmov 839922192   ;;  %v3447_v20 = vld [vmem:[#allocation5] sm:$0xff]  ;;  %s3296_s10 = smov 124  }
  0x31   :  { %330 = vperm.xlu1 %2956, %v3424_v2   ;;  %578 = vrot.lane.b32.xlu2 %v3430_v3, %s3293_s16  ;;  %v334_v9 = vunpack.c.l.s4 %v3294_v8  ;;  %v3454_v24 = vld [vmem:[#allocation16] sm:$0x3f]  ;;  %s3297_s17 = smov 120   ;;  %v3466_v28 = vld [vmem:[#allocation17] sm:$0x3]  ;;  %vm645_vm1 = vcmask 1043456  }
  0x32   :  { %v3498_v52 = vld [vmem:[#allocation19] sm:$0x3f]  ;;  %vm642_vm3 = vcmask 31744   ;;  %s2784_s22 = sshll.u32 %s3937_s15, 4  ;;  %s2785_s22 = int_to_ptr.hbm [resolvable:$true] %s2784_s22 }
  0x33   :  { %v3442_v10 = vunpack.c.0.s8 %v334_v9 }
  0x36   :  { %v301_v11 = vld.sshfl [vmem:[#allocation1 + $0x10] sm:$0xff pattern:$0x75316420]  ;;  %v302_v16 = vld.sshfl [vmem:[#allocation1 + $0x18] sm:$0xff pattern:$0x75316420] }
  0x37   :  { %v299_v12 = vld.sshfl [vmem:[#allocation1] sm:$0xff pattern:$0x75316420]  ;;  %v300_v13 = vld.sshfl [vmem:[#allocation1 + $0x8] sm:$0xff pattern:$0x75316420] }
  0x38   :  { %470 = vrot.lane.b32.xlu0 %v3435_v4, %s3293_s16 }
  0x39   :  { %447 = vperm.xlu2 %2957, %v3439_v5  }
  0x8b   :  { %v579_v6 = vpop.permute.xlu2 %578 }
  0x8c   :  { %v580_v7 = vrot.slane %v579_v6, 4  ;;  %v3512_v6 = vand.u32 127, %v273_v58 }
  0x8e   :  { %608 = vperm.xlu2 %2957, %v580_v7   ;;  %vm315_vm0 = vcmp.lt.s32.totalorder %v3512_v6, 1  ;;  %vm278_vm2 = vcmp.eq.s32.totalorder %v3512_v6, 0  ;;  %vm377_vm4 = vcmp.lt.s32.totalorder %v3512_v6, 127 }
  0x93   :  { %v448_v31 = vpop.permute.xlu2 %447 }
  0x94   :  { %v453_v32 = vperm.slane %v448_v31, %v3442_v10 }
  0x96   :  { %309 = vrot.lane.b32.xlu2 %v300_v13, %s3293_s16 }
  0xa2   :  { %v354_v14 = vpop.permute.xlu0 %353 }
  0xa3   :  { %v331_v15 = vpop.permute.xlu1 %330  ;;  %v355_v17 = vrot.slane %v354_v14, 4 }
  0xa4   :  { %v336_v18 = vperm.slane %v331_v15, %v3442_v10 }
  0xa5   :  { %392 = vperm.xlu1 %2956, %v355_v17  }
  0xa6   :  { %338 = vst [vmem:[#allocation1] ss:$2 sm:$0xff] %v336_v18 }
  0xa7   :  { %340 = vst [vmem:[#allocation1 + $0x10] ss:$2 sm:$0xff] %v336_v18 }
  0xa8   :  { %360 = vst [vmem:[#allocation1 + $0x10] ss:$2 sm:$0xff] %v3419_v1 }
  0xaa   :  { %v471_v19 = vpop.permute.xlu0 %470 }
  0xab   :  { %v472_v21 = vrot.slane %v471_v19, 4 }
  0xad   :  { %v3449_v22 = vld.sshfl [vmem:[#allocation1] sm:$0xff pattern:$0x75316420]  ;;  %500 = vperm.xlu0 %2958, %v472_v21   ;;  %555 = vperm.xlu1 %2956, %v3447_v20  }
  0xae   :  { %358 = vst [vmem:[#allocation1] ss:$2 sm:$0xff] %v3424_v2 }
  0xaf   :  { %v363_v23 = vld.sshfl [vmem:[#allocation1 + $0x10] sm:$0xff pattern:$0x75316420]  ;;  %v364_v26 = vld.sshfl [vmem:[#allocation1 + $0x18] sm:$0xff pattern:$0x75316420] }
  0xb0   :  { %373 = vrot.lane.b32.xlu2 %v363_v23, %s3295_s0 }
  0xb5   :  { %v361_v25 = vld.sshfl [vmem:[#allocation1] sm:$0xff pattern:$0x75316420]  ;;  %311 = vrot.lane.b32.xlu0 %v301_v11, %s3293_s16  ;;  %633 = vrot.lane.b32.xlu1 %v3454_v24, %s3296_s10  ;;  %v362_v27 = vld.sshfl [vmem:[#allocation1 + $0x8] sm:$0xff pattern:$0x75316420] }
  0xb8   :  { %369 = vrot.lane.b32.xlu2 %v361_v25, %s3295_s0 }
  0xbd   :  { %313 = vrot.lane.b32.xlu1 %v302_v16, %s3293_s16  ;;  %375 = vrot.lane.b32.xlu0 %v364_v26, %s3295_s0  ;;  %v3541_v16 = vadd.s32 384, %v3512_v6 }
  0xbf   :  { %vm3938_vm5 = vcmp.eq.s32.totalorder %v3541_v16, 511 }
  0xc0   :  { %930 = vrot.lane.b32.xlu2 %v3466_v28, %s3296_s10 }
  0xc5   :  { %307 = vrot.lane.b32.xlu1 %v299_v12, %s3293_s16  ;;  %828 = vrot.lane.b32.xlu0 %v3454_v24, %s3297_s17 }
  0xcd   :  { %371 = vrot.lane.b32.xlu1 %v362_v27, %s3295_s0 }
  0xe8   :  { %v609_v51 = vpop.permute.xlu2 %608 }
  0xe9   :  { %v614_v59 = vperm.slane %v609_v51, %v3442_v10 }
  0xf0   :  { %v310_v57 = vpop.permute.xlu2 %309 }
 0x10a   :  { %v374_v9 = vpop.permute.xlu2 %373 }
 0x112   :  { %v370_v18 = vpop.permute.xlu2 %369 }
 0x117   :  { %v393_v29 = vpop.permute.xlu1 %392 }
 0x118   :  { %v398_v30 = vperm.slane %v393_v29, %v3442_v10 }
 0x11a   :  { %400 = vst [vmem:[#allocation1] ss:$2 sm:$0xff] %v398_v30 }
 0x11b   :  { %402 = vst [vmem:[#allocation1 + $0x10] ss:$2 sm:$0xff] %v398_v30 }
 0x11c   :  { %422 = vst [vmem:[#allocation1] ss:$2 sm:$0xff] %v3439_v5 }
 0x11f   :  { %v501_v39 = vpop.permute.xlu0 %500  ;;  %v556_v45 = vpop.permute.xlu1 %555 }
 0x120   :  { %v506_v40 = vperm.slane %v501_v39, %v3442_v10  ;;  %v561_v46 = vperm.slane %v556_v45, %v3442_v10 }
 0x122   :  { %v3473_v33 = vld.sshfl [vmem:[#allocation1 + $0x18] sm:$0xff pattern:$0x75316420] }
 0x123   :  { %424 = vst [vmem:[#allocation1 + $0x10] ss:$2 sm:$0xff] %v3435_v4  ;;  %v425_v34 = vld.sshfl [vmem:[#allocation1] sm:$0xff pattern:$0x75316420] }
 0x124   :  { %v426_v35 = vld.sshfl [vmem:[#allocation1 + $0x8] sm:$0xff pattern:$0x75316420] }
 0x125   :  { %455 = vst [vmem:[#allocation1] ss:$2 sm:$0xff] %v453_v32  ;;  %435 = vrot.lane.b32.xlu0 %v426_v35, %s3293_s16 }
 0x127   :  { %v3496_v50 = vpop.permute.xlu1 %633  ;;  %v312_v8 = vpop.permute.xlu0 %311 }
 0x128   :  { %v317_v25 = vsel %vm315_vm0, %v310_v57, %v312_v8 }
 0x12a   :  { %v427_v36 = vld.sshfl [vmem:[#allocation1 + $0x10] sm:$0xff pattern:$0x75316420]  ;;  %v428_v37 = vld.sshfl [vmem:[#allocation1 + $0x18] sm:$0xff pattern:$0x75316420] }
 0x12b   :  { %437 = vrot.lane.b32.xlu1 %v427_v36, %s3293_s16  ;;  %439 = vrot.lane.b32.xlu2 %v428_v37, %s3293_s16  ;;  %457 = vst [vmem:[#allocation1 + $0x10] ss:$2 sm:$0xff] %v453_v32 }
 0x12c   :  { %v3479_v38 = vld.sshfl [vmem:[#allocation1] sm:$0xff pattern:$0x75316420]  ;;  %477 = vst [vmem:[#allocation1 + $0x10] ss:$2 sm:$0xff] %v3435_v4 }
 0x12d   :  { %475 = vst [vmem:[#allocation1] ss:$2 sm:$0xff] %v3439_v5 }
 0x12f   :  { %v314_v56 = vpop.permute.xlu1 %313  ;;  %v376_v17 = vpop.permute.xlu0 %375 }
 0x130   :  { %v316_v19 = vsel %vm315_vm0, %v312_v8, %v314_v56  ;;  %v381_v21 = vsel %vm377_vm4, %v376_v17, %v370_v18  ;;  %v378_v26 = vsel %vm377_vm4, %v374_v9, %v376_v17 }
 0x131   :  { %v414_v27 = vsel %vm3938_vm5, %v3473_v33, %v381_v21 }
 0x133   :  { %433 = vrot.lane.b32.xlu2 %v425_v34, %s3293_s16  ;;  %v481_v41 = vld.sshfl [vmem:[#allocation1 + $0x18] sm:$0xff pattern:$0x75316420]  ;;  %v480_v42 = vld.sshfl [vmem:[#allocation1 + $0x10] sm:$0xff pattern:$0x75316420] }
 0x134   :  { %v479_v43 = vld.sshfl [vmem:[#allocation1 + $0x8] sm:$0xff pattern:$0x75316420]  ;;  %492 = vrot.lane.b32.xlu1 %v481_v41, %s3295_s0  ;;  %v478_v44 = vld.sshfl [vmem:[#allocation1] sm:$0xff pattern:$0x75316420] }
 0x135   :  { %486 = vrot.lane.b32.xlu0 %v478_v44, %s3295_s0  ;;  %508 = vst [vmem:[#allocation1] ss:$2 sm:$0xff] %v506_v40 }
 0x136   :  { %530 = vst [vmem:[#allocation1] ss:$2 sm:$0xff] %v3447_v20 }
 0x137   :  { %510 = vst [vmem:[#allocation1 + $0x10] ss:$2 sm:$0xff] %v506_v40  ;;  %v308_v7 = vpop.permute.xlu1 %307  ;;  %v829_v32 = vpop.permute.xlu0 %828 }
 0x138   :  { %v319_v10 = vsel %vm315_vm0, %v314_v56, %v308_v7  ;;  %v318_v13 = vsel %vm315_vm0, %v308_v7, %v310_v57 }
 0x139   :  { %v349_v15 = vsel %vm278_vm2, %v3449_v22, %v319_v10 }
 0x13b   :  { %488 = vrot.lane.b32.xlu2 %v479_v43, %s3295_s0 }
 0x13c   :  { %1123 = vrot.lane.b32.xlu1 %v3466_v28, %s3297_s17 }
 0x13d   :  { %490 = vrot.lane.b32.xlu0 %v480_v42, %s3295_s0  ;;  %v534_v47 = vld.sshfl [vmem:[#allocation1 + $0x8] sm:$0xff pattern:$0x75316420]  ;;  %v533_v48 = vld.sshfl [vmem:[#allocation1] sm:$0xff pattern:$0x75316420] }
 0x13e   :  { %563 = vst [vmem:[#allocation1] ss:$2 sm:$0xff] %v561_v46  ;;  %v3493_v49 = vld.sshfl [vmem:[#allocation1 + $0x18] sm:$0xff pattern:$0x75316420] }
 0x13f   :  { %532 = vst [vmem:[#allocation1 + $0x10] ss:$2 sm:$0xff] %v3430_v3  ;;  %v372_v29 = vpop.permute.xlu1 %371 }
 0x140   :  { %v379_v30 = vsel %vm377_vm4, %v372_v29, %v374_v9  ;;  %v380_v31 = vsel %vm377_vm4, %v370_v18, %v372_v29 }
 0x144   :  { %543 = vrot.lane.b32.xlu1 %v534_v47, %s3293_s16 }
 0x145   :  { %1225 = vrot.lane.b32.xlu0 %v3498_v52, %s3296_s10  ;;  %v3503_v53 = vld.sshfl [vmem:[#allocation1] sm:$0xff pattern:$0x75316420] }
 0x146   :  { %v535_v54 = vld.sshfl [vmem:[#allocation1 + $0x10] sm:$0xff pattern:$0x75316420]  ;;  %v536_v55 = vld.sshfl [vmem:[#allocation1 + $0x18] sm:$0xff pattern:$0x75316420] }
 0x147   :  { %565 = vst [vmem:[#allocation1 + $0x10] ss:$2 sm:$0xff] %v561_v46  ;;  %545 = vrot.lane.b32.xlu2 %v535_v54, %s3293_s16 }
 0x148   :  { %585 = vst [vmem:[#allocation1 + $0x10] ss:$2 sm:$0xff] %v3430_v3 }
 0x149   :  { %583 = vst [vmem:[#allocation1] ss:$2 sm:$0xff] %v3447_v20 }
 0x14d   :  { %547 = vrot.lane.b32.xlu0 %v536_v55, %s3293_s16 }
 0x14f   :  { %v588_v60 = vld.sshfl [vmem:[#allocation1 + $0x10] sm:$0xff pattern:$0x75316420]  ;;  %v589_v61 = vld.sshfl [vmem:[#allocation1 + $0x18] sm:$0xff pattern:$0x75316420] }
 0x150   :  { %v586_v62 = vld.sshfl [vmem:[#allocation1] sm:$0xff pattern:$0x75316420]  ;;  %v587_v63 = vld.sshfl [vmem:[#allocation1 + $0x8] sm:$0xff pattern:$0x75316420]  ;;  %600 = vrot.lane.b32.xlu2 %v589_v61, %s3295_s0 }
 0x151   :  { %594 = vrot.lane.b32.xlu1 %v586_v62, %s3295_s0  ;;  %616 = vst [vmem:[#allocation1] ss:$2 sm:$0xff] %v614_v59 }
 0x152   :  { %635 = vst [vmem:[#allocation1] ss:$2 sm:$0xff] %v3424_v2 }
 0x153   :  { %618 = vst [vmem:[#allocation1 + $0x10] ss:$2 sm:$0xff] %v614_v59 }
 0x155   :  { %541 = vrot.lane.b32.xlu0 %v533_v48, %s3293_s16 }
 0x158   :  { %1418 = vrot.lane.b32.xlu2 %v3498_v52, %s3297_s17 }
 0x159   :  { %598 = vrot.lane.b32.xlu1 %v588_v60, %s3295_s0  ;;  %v638_v11 = vld.sshfl [vmem:[#allocation1] sm:$0xff pattern:$0x75316420]  ;;  %v639_v12 = vld.sshfl [vmem:[#allocation1 + $0x8] sm:$0xff pattern:$0x75316420] }
 0x15a   :  { %v3525_v14 = vld.sshfl [vmem:[#allocation1 + $0x18] sm:$0xff pattern:$0x75316420]  ;;  %2811 = vmatpush.msk.msra.mxu0 %vm645_vm1, %v638_v11  ;;  %2813 = vmatpush.msk.msra.mxu1 %vm645_vm1, %v639_v12  ;;  %932 = vst [vmem:[#allocation1] ss:$2 sm:$0xff] %v3439_v5 }
 0x15b   :  { %637 = vst [vmem:[#allocation1 + $0x10] ss:$2 sm:$0xff] %v3419_v1  ;;  %2814 = vmatmul.msk.f32.vlgmr.msra.gmra.mxu1 %vm642_vm3, %v3496_v50  ;;  %2812 = vmatmul.msk.f32.vlgmr.msra.gmra.mxu0 %vm642_vm3, %v3496_v50 }
 0x15c   :  { %2819 = vmatpush.msk.msrb.mxu0 %vm645_vm1, %v349_v15  ;;  %2821 = vmatpush.msk.msrb.mxu1 %vm645_vm1, %v318_v13 }
 0x15d   :  { %596 = vrot.lane.b32.xlu0 %v587_v63, %s3295_s0 }
 0x15e   :  { %2827 = vmatpush.msk.msra.mxu0 %vm645_vm1, %v380_v31  ;;  %2829 = vmatpush.msk.msra.mxu1 %vm645_vm1, %v379_v30 }
 0x161   :  { %v935_v33 = vld.sshfl [vmem:[#allocation1] sm:$0xff pattern:$0x75316420]  ;;  %v936_v34 = vld.sshfl [vmem:[#allocation1 + $0x8] sm:$0xff pattern:$0x75316420] }
 0x162   :  { %v641_v22 = vld.sshfl [vmem:[#allocation1 + $0x18] sm:$0xff pattern:$0x75316420]  ;;  %v640_v23 = vld.sshfl [vmem:[#allocation1 + $0x10] sm:$0xff pattern:$0x75316420] }
 0x163   :  { %2817 = vmatpush.msk.msra.mxu3 %vm645_vm1, %v641_v22  ;;  %2815 = vmatpush.msk.msra.mxu2 %vm645_vm1, %v640_v23  ;;  %934 = vst [vmem:[#allocation1 + $0x10] ss:$2 sm:$0xff] %v3435_v4 }
 0x164   :  { %2816 = vmatmul.msk.f32.vlgmr.msra.gmra.mxu2 %vm642_vm3, %v3496_v50  ;;  %2818 = vmatmul.msk.f32.vlgmr.msra.gmra.mxu3 %vm642_vm3, %v3496_v50  ;;  %1227 = vst [vmem:[#allocation1] ss:$2 sm:$0xff] %v3447_v20 }
 0x165   :  { %2825 = vmatpush.msk.msrb.mxu3 %vm645_vm1, %v316_v19  ;;  %2823 = vmatpush.msk.msrb.mxu2 %vm645_vm1, %v317_v25 }
 0x166   :  { %2820 = vmatmul.msk.f32.vlgmr.msrb.gmra.mxu0 %vm642_vm3, %v3454_v24  ;;  %2822 = vmatmul.msk.f32.vlgmr.msrb.gmra.mxu1 %vm642_vm3, %v3454_v24 }
 0x167   :  { %2833 = vmatpush.msk.msra.mxu3 %vm645_vm1, %v414_v27  ;;  %2831 = vmatpush.msk.msra.mxu2 %vm645_vm1, %v378_v26 }
 0x168   :  { %2835 = vmatpush.msk.msrb.mxu0 %vm645_vm1, %v935_v33  ;;  %2837 = vmatpush.msk.msrb.mxu1 %vm645_vm1, %v936_v34 }
 0x16a   :  { %v937_v35 = vld.sshfl [vmem:[#allocation1 + $0x10] sm:$0xff pattern:$0x75316420]  ;;  %v938_v36 = vld.sshfl [vmem:[#allocation1 + $0x18] sm:$0xff pattern:$0x75316420] }
 0x16b   :  { %1229 = vst [vmem:[#allocation1 + $0x10] ss:$2 sm:$0xff] %v3430_v3  ;;  %v1230_v44 = vld.sshfl [vmem:[#allocation1] sm:$0xff pattern:$0x75316420] }
 0x16c   :  { %2824 = vmatmul.msk.f32.vlgmr.msrb.gmra.mxu2 %vm642_vm3, %v3454_v24  ;;  %2826 = vmatmul.msk.f32.vlgmr.msrb.gmra.mxu3 %vm642_vm3, %v3454_v24  ;;  %v931_v24 = vpop.permute.xlu2 %930  ;;  %v1231_v45 = vld.sshfl [vmem:[#allocation1 + $0x8] sm:$0xff pattern:$0x75316420] }
 0x16d   :  { %2839 = vmatpush.msk.msrb.mxu2 %vm645_vm1, %v937_v35  ;;  %2841 = vmatpush.msk.msrb.mxu3 %vm645_vm1, %v938_v36  ;;  %1652 = vst [vmem:[#allocation1] ss:$2 sm:$0xff] %v3424_v2 }
 0x16e   :  { %2828 = vmatmul.msk.f32.vlgmr.msra.gmra.mxu0 %vm642_vm3, %v829_v32  ;;  %2830 = vmatmul.msk.f32.vlgmr.msra.gmra.mxu1 %vm642_vm3, %v829_v32  ;;  %1710 = vst [vmem:[#allocation1 + $0x1] ss:$2 sm:$0xff] %v3439_v5 }
 0x16f   :  { %1765 = vst [vmem:[#allocation1] ss:$2 sm:$0xff] %v3447_v20 }
 0x170   :  { %1787 = vst [vmem:[#allocation1] ss:$2 sm:$0xff] %v3419_v1 }
 0x171   :  { %1900 = vst [vmem:[#allocation1] ss:$2 sm:$0xff] %v3430_v3 }
 0x172   :  { %v1233_v48 = vld.sshfl [vmem:[#allocation1 + $0x18] sm:$0xff pattern:$0x75316420]  ;;  %1841 = vst [vmem:[#allocation1 + $0x1] ss:$2 sm:$0xff] %v3435_v4 }
 0x173   :  { %1996 = vst [vmem:[#allocation1] ss:$2 sm:$0xff] %v3439_v5  ;;  %v1232_v2 = vld.sshfl [vmem:[#allocation1 + $0x10] sm:$0xff pattern:$0x75316420] }
 0x174   :  { %2832 = vmatmul.msk.f32.vlgmr.msra.gmra.mxu2 %vm642_vm3, %v829_v32  ;;  %2834 = vmatmul.msk.f32.vlgmr.msra.gmra.mxu3 %vm642_vm3, %v829_v32  ;;  %1998 = vst [vmem:[#allocation1 + $0x10] ss:$2 sm:$0xff] %v3435_v4 }
 0x176   :  { %2836 = vmatmul.msk.f32.vlgmr.msrb.gmra.mxu0 %vm642_vm3, %v931_v24  ;;  %2838 = vmatmul.msk.f32.vlgmr.msrb.gmra.mxu1 %vm642_vm3, %v931_v24 }
 0x17c   :  { %2840 = vmatmul.msk.f32.vlgmr.msrb.gmra.mxu2 %vm642_vm3, %v931_v24  ;;  %2842 = vmatmul.msk.f32.vlgmr.msrb.gmra.mxu3 %vm642_vm3, %v931_v24 }
 0x185   :  { %v440_v37 = vpop.permute.xlu2 %439 }
 0x18d   :  { %v434_v39 = vpop.permute.xlu2 %433 }
 0x18e   :  { %v444_v40 = vsel %vm315_vm0, %v440_v37, %v434_v39 }
 0x18f   :  { %v466_v41 = vsel %vm278_vm2, %v3479_v38, %v444_v40 }
 0x190   :  { %2843 = vmatpush.msk.msra.mxu0 %vm645_vm1, %v466_v41 }
 0x191   :  { %2844 = vmatmul.msk.f32.vlgmr.msra.gmra.mxu0 %vm642_vm3, %v3466_v28 }
 0x195   :  { %v489_v1 = vpop.permute.xlu2 %488 }
 0x197   :  { %v436_v42 = vpop.permute.xlu0 %435 }
 0x198   :  { %v443_v43 = vsel %vm315_vm0, %v434_v39, %v436_v42 }
 0x199   :  { %2845 = vmatpush.msk.msra.mxu1 %vm645_vm1, %v443_v43 }
 0x19a   :  { %2846 = vmatmul.msk.f32.vlgmr.msra.gmra.mxu1 %vm642_vm3, %v3466_v28 }
 0x19d   :  { %v438_v38 = vpop.permute.xlu1 %437 }
 0x19e   :  { %v441_v46 = vsel %vm315_vm0, %v438_v38, %v440_v37  ;;  %v442_v47 = vsel %vm315_vm0, %v436_v42, %v438_v38 }
 0x19f   :  { %2847 = vmatpush.msk.msra.mxu2 %vm645_vm1, %v442_v47  ;;  %2849 = vmatpush.msk.msra.mxu3 %vm645_vm1, %v441_v46 }
 0x1a0   :  { %2848 = vmatmul.msk.f32.vlgmr.msra.gmra.mxu2 %vm642_vm3, %v3466_v28  ;;  %2850 = vmatmul.msk.f32.vlgmr.msra.gmra.mxu3 %vm642_vm3, %v3466_v28 }
 0x1a1   :  { %v546_v59 = vpop.permute.xlu2 %545 }
 0x1a6   :  { %v493_v50 = vpop.permute.xlu1 %492 }
 0x1a7   :  { %v487_v51 = vpop.permute.xlu0 %486 }
 0x1a8   :  { %v496_v54 = vsel %vm377_vm4, %v487_v51, %v489_v1  ;;  %v497_v55 = vsel %vm377_vm4, %v493_v50, %v487_v51 }
 0x1a9   :  { %v522_v56 = vsel %vm3938_vm5, %v3493_v49, %v497_v55  ;;  %2851 = vmatpush.msk.msrb.mxu0 %vm645_vm1, %v496_v54 }
 0x1aa   :  { %2857 = vmatpush.msk.msrb.mxu3 %vm645_vm1, %v522_v56  ;;  %v601_v63 = vpop.permute.xlu2 %600 }
 0x1ab   :  { %2859 = vmatpush.msk.msra.mxu0 %vm645_vm1, %v1230_v44 }
 0x1ac   :  { %2865 = vmatpush.msk.msra.mxu3 %vm645_vm1, %v1233_v48 }
 0x1ae   :  { %v1124_v28 = vpop.permute.xlu1 %1123 }
 0x1af   :  { %v491_v57 = vpop.permute.xlu0 %490  ;;  %2852 = vmatmul.msk.f32.vlgmr.msrb.gmra.mxu0 %vm642_vm3, %v1124_v28  ;;  %2858 = vmatmul.msk.f32.vlgmr.msrb.gmra.mxu3 %vm642_vm3, %v1124_v28 }
 0x1b0   :  { %v494_v58 = vsel %vm377_vm4, %v491_v57, %v493_v50  ;;  %v495_v49 = vsel %vm377_vm4, %v489_v1, %v491_v57 }
 0x1b1   :  { %2853 = vmatpush.msk.msrb.mxu1 %vm645_vm1, %v495_v49  ;;  %2855 = vmatpush.msk.msrb.mxu2 %vm645_vm1, %v494_v58  ;;  %v3696_v58 = vld.sshfl [vmem:[#allocation1 + $0x18] sm:$0xff pattern:$0x75316420]  ;;  %v3698_v49 = vld.sshfl [vmem:[#allocation1 + $0x10] sm:$0xff pattern:$0x75316420] }
 0x1b2   :  { %2854 = vmatmul.msk.f32.vlgmr.msrb.gmra.mxu1 %vm642_vm3, %v1124_v28  ;;  %2856 = vmatmul.msk.f32.vlgmr.msrb.gmra.mxu2 %vm642_vm3, %v1124_v28  ;;  %v1419_v17 = vpop.permute.xlu2 %1418  ;;  %2013 = vst [vmem:[#allocation1 + $0x10] ss:$2 sm:$0xff] %v3430_v3 }
 0x1b3   :  { %2861 = vmatpush.msk.msra.mxu1 %vm645_vm1, %v1231_v45  ;;  %2863 = vmatpush.msk.msra.mxu2 %vm645_vm1, %v1232_v2 }
 0x1b6   :  { %v544_v60 = vpop.permute.xlu1 %543 }
 0x1b7   :  { %v1226_v61 = vpop.permute.xlu0 %1225  ;;  %v550_v62 = vsel %vm315_vm0, %v544_v60, %v546_v59 }
 0x1b8   :  { %2866 = vmatmul.msk.f32.vlgmr.msra.gmra.mxu3 %vm642_vm3, %v1226_v61  ;;  %2860 = vmatmul.msk.f32.vlgmr.msra.gmra.mxu0 %vm642_vm3, %v1226_v61 }
 0x1b9   :  { %2871 = vmatpush.msk.msrb.mxu2 %vm645_vm1, %v550_v62 }
 0x1ba   :  { %2862 = vmatmul.msk.f32.vlgmr.msra.gmra.mxu1 %vm642_vm3, %v1226_v61  ;;  %2864 = vmatmul.msk.f32.vlgmr.msra.gmra.mxu2 %vm642_vm3, %v1226_v61 }
 0x1bf   :  { %v548_v7 = vpop.permute.xlu0 %547 }
 0x1c0   :  { %v549_v8 = vsel %vm315_vm0, %v546_v59, %v548_v7 }
 0x1c1   :  { %2873 = vmatpush.msk.msrb.mxu3 %vm645_vm1, %v549_v8  ;;  %v3703_v8 = vld.sshfl [vmem:[#allocation1] sm:$0xff pattern:$0x75316420] }
 0x1c2   :  { %2872 = vmatmul.msk.f32.vlgmr.msrb.gmra.mxu2 %vm642_vm3, %v3498_v52  ;;  %2874 = vmatmul.msk.f32.vlgmr.msrb.gmra.mxu3 %vm642_vm3, %v3498_v52 }
 0x1c3   :  { %v595_v9 = vpop.permute.xlu1 %594 }
 0x1c4   :  { %v605_v10 = vsel %vm377_vm4, %v601_v63, %v595_v9 }
 0x1c5   :  { %v630_v11 = vsel %vm3938_vm5, %v3525_v14, %v605_v10 }
 0x1c6   :  { %2881 = vmatpush.msk.msra.mxu3 %vm645_vm1, %v630_v11 }
 0x1c7   :  { %v542_v12 = vpop.permute.xlu0 %541 }
 0x1c8   :  { %v551_v13 = vsel %vm315_vm0, %v542_v12, %v544_v60  ;;  %v552_v15 = vsel %vm315_vm0, %v548_v7, %v542_v12  ;;  %v3701_v7 = vld.sshfl [vmem:[#allocation1 + $0x8] sm:$0xff pattern:$0x75316420] }
 0x1c9   :  { %v574_v18 = vsel %vm278_vm2, %v3503_v53, %v552_v15  ;;  %2869 = vmatpush.msk.msrb.mxu1 %vm645_vm1, %v551_v13  ;;  %2011 = vst [vmem:[#allocation1] ss:$2 sm:$0xff] %v3447_v20 }
 0x1ca   :  { %2867 = vmatpush.msk.msrb.mxu0 %vm645_vm1, %v574_v18  ;;  %2870 = vmatmul.msk.f32.vlgmr.msrb.gmra.mxu1 %vm642_vm3, %v3498_v52 }
 0x1cb   :  { %v599_v14 = vpop.permute.xlu1 %598  ;;  %2882 = vmatmul.msk.f32.vlgmr.msra.gmra.mxu3 %vm642_vm3, %v1419_v17  ;;  %2868 = vmatmul.msk.f32.vlgmr.msrb.gmra.mxu0 %vm642_vm3, %v3498_v52 }
 0x1cc   :  { %v602_v19 = vsel %vm377_vm4, %v599_v14, %v601_v63 }
 0x1cd   :  { %2879 = vmatpush.msk.msra.mxu2 %vm645_vm1, %v602_v19 }
 0x1ce   :  { %2880 = vmatmul.msk.f32.vlgmr.msra.gmra.mxu2 %vm642_vm3, %v1419_v17 }
 0x1cf   :  { %v597_v53 = vpop.permute.xlu0 %596 }
 0x1d0   :  { %v603_v21 = vsel %vm377_vm4, %v597_v53, %v599_v14  ;;  %v604_v22 = vsel %vm377_vm4, %v595_v9, %v597_v53 }
 0x1d1   :  { %2875 = vmatpush.msk.msra.mxu0 %vm645_vm1, %v604_v22  ;;  %2877 = vmatpush.msk.msra.mxu1 %vm645_vm1, %v603_v21 }
 0x1d2   :  { %2878 = vmatmul.msk.f32.vlgmr.msra.gmra.mxu1 %vm642_vm3, %v1419_v17 }
 0x1d3   :  { %2876 = vmatmul.msk.f32.vlgmr.msra.gmra.mxu0 %vm642_vm3, %v1419_v17 }
 0x1d8   :  { %v691_v23 = vpop.f32.mrf.mxu1  ;;  %v671_v26 = vpop.f32.mrf.mxu0 }
 0x1e3   :  { %v785_v29 = vpop.f32.mrf.mxu1  ;;  %v765_v31 = vpop.f32.mrf.mxu0 }
 0x1e4   :  { %v766_v9 = vadd.f32 %v765_v31, %v671_v26  ;;  %v786_v10 = vadd.f32 %v785_v29, %v691_v23  ;;  %v3717_v29 = vld.sshfl [vmem:[#allocation1 + $0x18] sm:$0xff pattern:$0x75316420] }
 0x1e7   :  { %v731_v52 = vpop.f32.mrf.mxu3  ;;  %v711_v25 = vpop.f32.mrf.mxu2 }
 0x1eb   :  { %v881_v33 = vpop.f32.mrf.mxu1  ;;  %v861_v35 = vpop.f32.mrf.mxu0 }
 0x1ec   :  { %v924_v19 = vadd.f32 %v861_v35, %v766_v9  ;;  %v925_v53 = vadd.f32 %v881_v33, %v786_v10 }
 0x1ef   :  { %v825_v27 = vpop.f32.mrf.mxu3  ;;  %v805_v30 = vpop.f32.mrf.mxu2 }
 0x1f0   :  { %v826_v62 = vadd.f32 %v825_v27, %v731_v52  ;;  %v806_v13 = vadd.f32 %v805_v30, %v711_v25  ;;  %v3709_v52 = vld [vmem:[%s3934_s12] sm:$0xf]  ;;  %v3715_v25 = vld.sshfl [vmem:[#allocation1 + $0x10] sm:$0xff pattern:$0x75316420] }
 0x1f1   :  { %2082 = vrot.lane.b32.xlu1 %v3709_v52, %s3296_s10  ;;  %2272 = vrot.lane.b32.xlu2 %v3709_v52, %s3297_s17  ;;  %2740 = vst [vmem:[#allocation1 + $0x10] ss:$2 sm:$0xff] %v3435_v4 }
 0x1f3   :  { %v986_v24 = vpop.f32.mrf.mxu1  ;;  %v966_v39 = vpop.f32.mrf.mxu0 }
 0x1f7   :  { %v921_v32 = vpop.f32.mrf.mxu3  ;;  %v901_v34 = vpop.f32.mrf.mxu2 }
 0x1f8   :  { %v927_v17 = vadd.f32 %v921_v32, %v826_v62  ;;  %v926_v30 = vadd.f32 %v901_v34, %v806_v13 }
 0x1ff   :  { %v1026_v36 = vpop.f32.mrf.mxu3  ;;  %v1006_v37 = vpop.f32.mrf.mxu2 }
 0x20e   :  { %v1060_v43 = vpop.f32.mrf.mxu0 }
 0x20f   :  { %v1061_v55 = vadd.f32 %v1060_v43, %v966_v39 }
 0x217   :  { %v1080_v41 = vpop.f32.mrf.mxu1 }
 0x218   :  { %v1081_v54 = vadd.f32 %v1080_v41, %v986_v24  ;;  %v3722_v41 = vld.sshfl [vmem:[#allocation1] sm:$0xff pattern:$0x75316420] }
 0x223   :  { %v1120_v40 = vpop.f32.mrf.mxu3  ;;  %v1100_v42 = vpop.f32.mrf.mxu2 }
 0x224   :  { %v1121_v50 = vadd.f32 %v1120_v40, %v1026_v36  ;;  %v1101_v59 = vadd.f32 %v1100_v42, %v1006_v37  ;;  %v3724_v42 = vld.sshfl [vmem:[#allocation1 + $0x8] sm:$0xff pattern:$0x75316420] }
 0x225   :  { %2738 = vst [vmem:[#allocation1] ss:$2 sm:$0xff] %v3439_v5 }
 0x22c   :  { %v1156_v46 = vpop.f32.mrf.mxu0 }
 0x22d   :  { %v1219_v63 = vadd.f32 %v1156_v46, %v1061_v55 }
 0x22f   :  { %v1176_v45 = vpop.f32.mrf.mxu1  ;;  %v1526_v18 = vrot.slane %v1219_v63, 4 }
 0x230   :  { %v1220_v60 = vadd.f32 %v1176_v45, %v1081_v54 }
 0x231   :  { %v1534_v36 = vadd.f32 %v1526_v18, %v924_v19 }
 0x232   :  { %v1216_v44 = vpop.f32.mrf.mxu3  ;;  %v1527_v15 = vrot.slane %v1220_v60, 4 }
 0x233   :  { %v1222_v56 = vadd.f32 %v1216_v44, %v1121_v50 }
 0x234   :  { %v1535_v31 = vadd.f32 %v1527_v15, %v925_v53 }
 0x235   :  { %v1196_v38 = vpop.f32.mrf.mxu2  ;;  %v1261_v1 = vpop.f32.mrf.mxu0  ;;  %v1529_v12 = vrot.slane %v1222_v56, 4 }
 0x236   :  { %v1221_v11 = vadd.f32 %v1196_v38, %v1101_v59 }
 0x237   :  { %v1281_v2 = vpop.f32.mrf.mxu1  ;;  %v1537_v23 = vadd.f32 %v1529_v12, %v927_v17 }
 0x238   :  { %v1528_v3 = vrot.slane %v1221_v11, 4 }
 0x23a   :  { %v1536_v43 = vadd.f32 %v1528_v3, %v926_v30  ;;  %v3298_v3 = vmov 127  }
 0x23b   :  { %v1321_v47 = vpop.f32.mrf.mxu3  ;;  %2959 = vset.pattern.permute.xlu0 %v3298_v3  ;;  %2961 = vset.pattern.permute.xlu1 %v3298_v3 }
 0x23d   :  { %v1301_v48 = vpop.f32.mrf.mxu2 }
 0x245   :  { %v1415_v51 = vpop.f32.mrf.mxu3  ;;  %v1395_v28 = vpop.f32.mrf.mxu2 }
 0x246   :  { %v1416_v14 = vadd.f32 %v1415_v51, %v1321_v47  ;;  %v1396_v32 = vadd.f32 %v1395_v28, %v1301_v48 }
 0x247   :  { %v1375_v57 = vpop.f32.mrf.mxu1 }
 0x248   :  { %v1355_v61 = vpop.f32.mrf.mxu0  ;;  %v1376_v21 = vadd.f32 %v1375_v57, %v1281_v2 }
 0x249   :  { %v1356_v26 = vadd.f32 %v1355_v61, %v1261_v1 }
 0x24e   :  { %v1511_v22 = vpop.f32.mrf.mxu3 }
 0x24f   :  { %v1517_v27 = vadd.f32 %v1511_v22, %v1416_v14  ;;  %v1471_v20 = vpop.f32.mrf.mxu1 }
 0x250   :  { %v1515_v33 = vadd.f32 %v1471_v20, %v1376_v21  ;;  %v1451_v35 = vpop.f32.mrf.mxu0 }
 0x251   :  { %v3720_v24 = vadd.f32 %v1517_v27, %v927_v17  ;;  %v1541_v37 = vadd.f32 %v1537_v23, %v1517_v27  ;;  %v1491_v39 = vpop.f32.mrf.mxu2  ;;  %v1514_v40 = vadd.f32 %v1451_v35, %v1356_v26 }
 0x252   :  { %v1516_v44 = vadd.f32 %v1491_v39, %v1396_v32  ;;  %v3726_v45 = vadd.f32 %v1515_v33, %v925_v53  ;;  %v1539_v34 = vadd.f32 %v1535_v31, %v1515_v33 }
 0x253   :  { %v2886_v38 = vmul.f32 -1.442695, %v1541_v37  ;;  %v3729_v46 = vadd.f32 %v1514_v40, %v924_v19  ;;  %v1538_v4 = vadd.f32 %v1534_v36, %v1514_v40 }
 0x254   :  { %v3731_v47 = vadd.f32 %v1516_v44, %v926_v30  ;;  %v1540_v48 = vadd.f32 %v1536_v43, %v1516_v44  ;;  %v2884_v2 = vmul.f32 -1.442695, %v1539_v34 }
 0x255   :  { %2963 = vpow2.f32 %v2886_v38  ;;  %v2883_v1 = vmul.f32 -1.442695, %v1538_v4 }
 0x256   :  { %v2885_v50 = vmul.f32 -1.442695, %v1540_v48  ;;  %2965 = vpow2.f32 %v2884_v2 }
 0x257   :  { %2967 = vpow2.f32 %v2883_v1 }
 0x258   :  { %2969 = vpow2.f32 %v2885_v50 }
 0x25b   :  { %v2964_v51 = vpop.eup %2963 }
 0x25c   :  { %v2966_v54 = vpop.eup %2965  ;;  %v1557_v55 = vadd.f32 1.0, %v2964_v51 }
 0x25d   :  { %v2968_v56 = vpop.eup %2967  ;;  %v1555_v28 = vadd.f32 1.0, %v2966_v54 }
 0x25e   :  { %v2970_v5 = vpop.eup %2969  ;;  %2971 = vrcp.f32 %v1557_v55  ;;  %v3733_v59 = vadd.f32 1.0, %v2968_v56  ;;  %v1612_v60 = vand.u32 2147483647, %v1557_v55  ;;  %v1614_v62 = vand.u32 2147483648, %v1557_v55 }
 0x25f   :  { %v1556_v57 = vadd.f32 1.0, %v2970_v5  ;;  %2973 = vrcp.f32 %v1555_v28  ;;  %vm1608_vm6 = vweird.f32 %v1557_v55  ;;  %vm1578_vm8 = vweird.f32 %v1555_v28 }
 0x260   :  { %vm3736_vm7 = vcmp.eq.f32.partialorder %v1612_v60, 8.507059e+37  ;;  %v1582_v15 = vand.u32 2147483647, %v1555_v28  ;;  %v1584_v17 = vand.u32 2147483648, %v1555_v28  ;;  %v1615_v14 = vor.u32 1.1754944e-38, %v1614_v62 }
 0x261   :  { %2975 = vrcp.f32 %v1556_v57  ;;  %vm1593_vm9 = vweird.f32 %v1556_v57  ;;  %v1597_v22 = vand.u32 2147483647, %v1556_v57  ;;  %v1599_v27 = vand.u32 2147483648, %v1556_v57 }
 0x262   :  { %2977 = vrcp.f32 %v3733_v59  ;;  %vm3743_vm12 = vcmp.eq.f32.partialorder %v1582_v15, 8.507059e+37  ;;  %v1585_v33 = vor.u32 1.1754944e-38, %v1584_v17  ;;  %v1569_v37 = vand.u32 2147483648, %v3733_v59 }
 0x263   :  { %v1567_v43 = vand.u32 2147483647, %v3733_v59  ;;  %v1600_v4 = vor.u32 1.1754944e-38, %v1599_v27 }
 0x264   :  { %v2972_v61 = vpop.eup %2971  ;;  %v1570_v54 = vor.u32 1.1754944e-38, %v1569_v37 }
 0x265   :  { %v2974_v63 = vpop.eup %2973  ;;  %v1604_v9 = vmul.f32 %v2972_v61, %v1557_v55  ;;  %vm1609_vm10 = vweird.f32 %v2972_v61 }
 0x266   :  { %v1574_v11 = vmul.f32 %v2974_v63, %v1555_v28  ;;  %vm1579_vm11 = vweird.f32 %v2974_v63  ;;  %vm1610_vm13 = vmor %vm1608_vm6, %vm1609_vm10  ;;  %vm1563_vm6 = vweird.f32 %v3733_v59 }
 0x267   :  { %v2976_v12 = vpop.eup %2975  ;;  %v1605_v13 = vsub.f32 1.0, %v1604_v9  ;;  %vm1580_vm15 = vmor %vm1578_vm8, %vm1579_vm11  ;;  %vm1598_vm8 = vcmp.eq.f32.partialorder %v1597_v22, 8.507059e+37 }
 0x268   :  { %v2978_v18 = vpop.eup %2977  ;;  %v1589_v19 = vmul.f32 %v2976_v12, %v1556_v57  ;;  %v1575_v53 = vsub.f32 1.0, %v1574_v11  ;;  %vm1594_vm14 = vweird.f32 %v2976_v12 }
 0x269   :  { %v1606_v21 = vmul.f32 %v2972_v61, %v1605_v13  ;;  %v1559_v23 = vmul.f32 %v2978_v18, %v3733_v59  ;;  %vm1564_vm5 = vweird.f32 %v2978_v18  ;;  %vm1595_vm10 = vmor %vm1593_vm9, %vm1594_vm14 }
 0x26a   :  { %v1590_v26 = vsub.f32 1.0, %v1589_v19  ;;  %v1576_v20 = vmul.f32 %v2974_v63, %v1575_v53  ;;  %vm1565_vm11 = vmor %vm1563_vm6, %vm1564_vm5  ;;  %vm3943_vm5 = vcmp.eq.s32.totalorder %v3541_v16, 511 }
 0x26b   :  { %v1607_v30 = vadd.f32 %v2972_v61, %v1606_v21  ;;  %v1560_v31 = vsub.f32 1.0, %v1559_v23 }
 0x26c   :  { %v1591_v35 = vmul.f32 %v2976_v12, %v1590_v26  ;;  %v1577_v36 = vadd.f32 %v2974_v63, %v1576_v20 }
 0x26d   :  { %v1561_v39 = vmul.f32 %v2978_v18, %v1560_v31  ;;  %v1611_v40 = vsel %vm1610_vm13, %v2972_v61, %v1607_v30 }
 0x26e   :  { %v1592_v44 = vadd.f32 %v2976_v12, %v1591_v35  ;;  %v3753_v34 = vsel %vm3736_vm7, %v1615_v14, %v1611_v40  ;;  %v1581_v38 = vsel %vm1580_vm15, %v2974_v63, %v1577_v36  ;;  %vm1568_vm7 = vcmp.eq.f32.partialorder %v1567_v43, 8.507059e+37 }
 0x26f   :  { %v1995_v48 = vperm.slane %v3753_v34, 4  ;;  %v3760_v2 = vsel %vm3743_vm12, %v1585_v33, %v1581_v38  ;;  %v1562_v1 = vadd.f32 %v2978_v18, %v1561_v39 }
 0x270   :  { %v1596_v50 = vsel %vm1595_vm10, %v2976_v12, %v1592_v44  ;;  %v1993_v51 = vperm.slane %v3760_v2, 4 }
 0x271   :  { %v2010_v55 = vmul.f32 %v3696_v58, %v1995_v48  ;;  %v3764_v56 = vsel %vm1598_vm8, %v1600_v4, %v1596_v50  ;;  %v1566_v28 = vsel %vm1565_vm11, %v2978_v18, %v1562_v1  ;;  %v2025_v62 = vmul.f32 %v3717_v29, %v1995_v48 }
 0x272   :  { %v1994_v5 = vperm.slane %v3764_v56, 4  ;;  %v2008_v57 = vmul.f32 %v3701_v7, %v1993_v51  ;;  %v3768_v59 = vsel %vm1568_vm7, %v1570_v54, %v1566_v28 }
 0x273   :  { %2895 = vmatpush.msk.msrb.mxu3 %vm645_vm1, %v2010_v55  ;;  %v1992_v60 = vperm.slane %v3768_v59, 4 }
 0x274   :  { %v2009_v61 = vmul.f32 %v3698_v49, %v1994_v5  ;;  %2035 = vrot.lane.b32.xlu1 %v2008_v57, %s3293_s16  ;;  %2891 = vmatpush.msk.msrb.mxu1 %vm645_vm1, %v2008_v57  ;;  %v3782_v7 = vmul.f32 %v3715_v25, %v1994_v5  ;;  %v3793_v49 = vld [vmem:[%s3935_s13] sm:$0xf]  ;;  %v2023_v25 = vmul.f32 %v3724_v42, %v1993_v51  ;;  %s3299_s13 = smov [#allocation20]  }
 0x275   :  { %v2007_v58 = vmul.f32 %v3703_v8, %v1992_v60  ;;  %v2022_v8 = vmul.f32 %v3722_v41, %v1992_v60  ;;  %v2083_v41 = vpop.permute.xlu1 %2082  ;;  %s2782_s1 = sshll.u32 %s3299_s13, 4  ;;  %s2783_s1 = int_to_ptr.vmem [resolvable:$true] %s2782_s1 }
 0x276   :  { %2893 = vmatpush.msk.msrb.mxu2 %vm645_vm1, %v2009_v61  ;;  %2892 = vmatmul.msk.f32.vlgmr.msrb.gmra.mxu1 %vm642_vm3, %v2083_v41 }
 0x277   :  { %2060 = vrot.lane.b32.xlu0 %v2007_v58, %s3295_s0  ;;  %2033 = vrot.lane.b32.xlu2 %v2007_v58, %s3293_s16 }
 0x278   :  { %2889 = vmatpush.msk.msrb.mxu0 %vm645_vm1, %v2007_v58  ;;  %2894 = vmatmul.msk.f32.vlgmr.msrb.gmra.mxu2 %vm642_vm3, %v2083_v41 }
 0x279   :  { %2890 = vmatmul.msk.f32.vlgmr.msrb.gmra.mxu0 %vm642_vm3, %v2083_v41  ;;  %2896 = vmatmul.msk.f32.vlgmr.msrb.gmra.mxu3 %vm642_vm3, %v2083_v41 }
 0x27c   :  { %2062 = vrot.lane.b32.xlu1 %v2008_v57, %s3295_s0 }
 0x27f   :  { %2383 = vrot.lane.b32.xlu0 %v3782_v7, %s3293_s16  ;;  %2047 = vperm.xlu2 %2957, %v2007_v58  }
 0x284   :  { %2064 = vrot.lane.b32.xlu1 %v2009_v61, %s3295_s0 }
 0x287   :  { %2039 = vrot.lane.b32.xlu0 %v2010_v55, %s3293_s16  ;;  %2037 = vrot.lane.b32.xlu2 %v2009_v61, %s3293_s16 }
 0x28c   :  { %2066 = vrot.lane.b32.xlu1 %v2010_v55, %s3295_s0 }
 0x28f   :  { %2074 = vperm.xlu0 %2959, %v2010_v55   ;;  %2428 = vrot.lane.b32.xlu2 %v3793_v49, %s3296_s10 }
 0x294   :  { %2406 = vrot.lane.b32.xlu1 %v2022_v8, %s3295_s0 }
 0x297   :  { %2379 = vrot.lane.b32.xlu0 %v2022_v8, %s3293_s16  ;;  %2381 = vrot.lane.b32.xlu2 %v2023_v25, %s3293_s16 }
 0x298   :  { %2960 = vset.pattern.permute.xlu0 %v3292_v0  ;;  %v2273_v0 = vpop.permute.xlu2 %2272 }
 0x29c   :  { %2385 = vrot.lane.b32.xlu1 %v2025_v62, %s3293_s16 }
 0x29f   :  { %2393 = vperm.xlu0 %2960, %v2022_v8   ;;  %2410 = vrot.lane.b32.xlu2 %v3782_v7, %s3295_s0 }
 0x2a4   :  { %2420 = vperm.xlu1 %2961, %v2025_v62  }
 0x2a7   :  { %2412 = vrot.lane.b32.xlu2 %v2025_v62, %s3295_s0  ;;  %2962 = vset.pattern.permute.xlu0 %v3298_v3 }
 0x2ac   :  { %2618 = vrot.lane.b32.xlu1 %v3793_v49, %s3297_s17 }
 0x2af   :  { %2408 = vrot.lane.b32.xlu2 %v2023_v25, %s3295_s0 }
 0x2d1   :  { %v2034_v29 = vpop.permute.xlu2 %2033 }
 0x2d9   :  { %v2048_v42 = vpop.permute.xlu2 %2047 }
 0x2e1   :  { %v2038_v63 = vpop.permute.xlu2 %2037 }
 0x2e6   :  { %v2036_v9 = vpop.permute.xlu1 %2035 }
 0x2e7   :  { %v2042_v10 = vsel %vm315_vm0, %v2036_v9, %v2038_v63  ;;  %v2043_v11 = vsel %vm315_vm0, %v2034_v29, %v2036_v9 }
 0x2e8   :  { %2899 = vmatpush.msk.msra.mxu1 %vm645_vm1, %v2043_v11  ;;  %2901 = vmatpush.msk.msra.mxu2 %vm645_vm1, %v2042_v10 }
 0x2e9   :  { %v2061_v12 = vpop.permute.xlu0 %2060  ;;  %v2429_v13 = vpop.permute.xlu2 %2428  ;;  %2900 = vmatmul.msk.f32.vlgmr.msra.gmra.mxu1 %vm642_vm3, %v3709_v52  ;;  %2902 = vmatmul.msk.f32.vlgmr.msra.gmra.mxu2 %vm642_vm3, %v3709_v52 }
 0x2ee   :  { %v2063_v15 = vpop.permute.xlu1 %2062 }
 0x2ef   :  { %v2070_v26 = vsel %vm377_vm4, %v2061_v12, %v2063_v15 }
 0x2f1   :  { %v2384_v17 = vpop.permute.xlu0 %2383  ;;  %v2382_v18 = vpop.permute.xlu2 %2381 }
 0x2f3   :  { %v2135_v5 = vpop.f32.mrf.mxu1 }
 0x2f6   :  { %v2065_v14 = vpop.permute.xlu1 %2064  ;;  %v2115_v57 = vpop.f32.mrf.mxu0 }
 0x2f7   :  { %v2069_v19 = vsel %vm377_vm4, %v2063_v15, %v2065_v14 }
 0x2f8   :  { %2907 = vmatpush.msk.msrb.mxu1 %vm645_vm1, %v2069_v19  ;;  %v2730_v19 = vsub.f32 1.0, %v3768_v59 }
 0x2f9   :  { %v2040_v53 = vpop.permute.xlu0 %2039  ;;  %v2411_v3 = vpop.permute.xlu2 %2410  ;;  %2908 = vmatmul.msk.f32.vlgmr.msrb.gmra.mxu1 %vm642_vm3, %v2273_v0 }
 0x2fa   :  { %v2041_v21 = vsel %vm315_vm0, %v2038_v63, %v2040_v53  ;;  %v2044_v22 = vsel %vm315_vm0, %v2040_v53, %v2034_v29  ;;  %2915 = vmatpush.msk.msra.mxu1 %vm645_vm1, %v2023_v25 }
 0x2fb   :  { %v2050_v23 = vsel %vm278_vm2, %v2048_v42, %v2044_v22  ;;  %2903 = vmatpush.msk.msra.mxu3 %vm645_vm1, %v2041_v21  ;;  %v2155_v60 = vpop.f32.mrf.mxu2 }
 0x2fc   :  { %2897 = vmatpush.msk.msra.mxu0 %vm645_vm1, %v2050_v23  ;;  %2904 = vmatmul.msk.f32.vlgmr.msra.gmra.mxu3 %vm642_vm3, %v3709_v52  ;;  %v2175_v6 = vpop.f32.mrf.mxu3 }
 0x2fd   :  { %2898 = vmatmul.msk.f32.vlgmr.msra.gmra.mxu0 %vm642_vm3, %v3709_v52  ;;  %v2388_v52 = vsel %vm315_vm0, %v2382_v18, %v2384_v17 }
 0x2fe   :  { %2905 = vmatpush.msk.msrb.mxu0 %vm645_vm1, %v2070_v26  ;;  %v2067_v27 = vpop.permute.xlu1 %2066 }
 0x2ff   :  { %v2068_v20 = vsel %vm377_vm4, %v2065_v14, %v2067_v27  ;;  %v2071_v30 = vsel %vm377_vm4, %v2067_v27, %v2061_v12 }
 0x300   :  { %2913 = vmatpush.msk.msra.mxu0 %vm645_vm1, %v2022_v8  ;;  %2909 = vmatpush.msk.msrb.mxu2 %vm645_vm1, %v2068_v20  ;;  %v2754_v20 = vperm.slane %v3760_v2, 5 }
 0x301   :  { %v2075_v31 = vpop.permute.xlu0 %2074  ;;  %v2413_v32 = vpop.permute.xlu2 %2412  ;;  %2910 = vmatmul.msk.f32.vlgmr.msrb.gmra.mxu2 %vm642_vm3, %v2273_v0  ;;  %2916 = vmatmul.msk.f32.vlgmr.msra.gmra.mxu1 %vm642_vm3, %v2429_v13 }
 0x302   :  { %v2080_v33 = vsel %vm3943_vm5, %v2075_v31, %v2071_v30  ;;  %2917 = vmatpush.msk.msra.mxu2 %vm645_vm1, %v3782_v7  ;;  %v2414_v36 = vsel %vm377_vm4, %v2411_v3, %v2413_v32  ;;  %v2733_v30 = vsub.f32 1.0, %v3753_v34 }
 0x303   :  { %2911 = vmatpush.msk.msrb.mxu3 %vm645_vm1, %v2080_v33 }
 0x304   :  { %2925 = vmatpush.msk.msrb.mxu2 %vm645_vm1, %v2388_v52  ;;  %2912 = vmatmul.msk.f32.vlgmr.msrb.gmra.mxu3 %vm642_vm3, %v2273_v0  ;;  %v2734_v52 = vperm.slane %v2730_v19, 5 }
 0x305   :  { %2919 = vmatpush.msk.msra.mxu3 %vm645_vm1, %v2025_v62  ;;  %2906 = vmatmul.msk.f32.vlgmr.msrb.gmra.mxu0 %vm642_vm3, %v2273_v0 }
 0x306   :  { %v2407_v35 = vpop.permute.xlu1 %2406 }
 0x307   :  { %v2417_v51 = vsel %vm377_vm4, %v2413_v32, %v2407_v35 }
 0x309   :  { %v2380_v37 = vpop.permute.xlu0 %2379  ;;  %v2409_v39 = vpop.permute.xlu2 %2408  ;;  %2918 = vmatmul.msk.f32.vlgmr.msra.gmra.mxu2 %vm642_vm3, %v2429_v13 }
 0x30a   :  { %v2389_v40 = vsel %vm315_vm0, %v2380_v37, %v2382_v18  ;;  %v2415_v43 = vsel %vm377_vm4, %v2409_v39, %v2411_v3  ;;  %2933 = vmatpush.msk.msra.mxu2 %vm645_vm1, %v2414_v36  ;;  %v2416_v50 = vsel %vm377_vm4, %v2407_v35, %v2409_v39  ;;  %v2731_v18 = vsub.f32 1.0, %v3760_v2 }
 0x30b   :  { %2923 = vmatpush.msk.msrb.mxu1 %vm645_vm1, %v2389_v40  ;;  %v2741_v40 = vld.sshfl [vmem:[#allocation1] sm:$0xff pattern:$0x75316420]  ;;  %v2732_v2 = vsub.f32 1.0, %v3764_v56 }
 0x30c   :  { %2920 = vmatmul.msk.f32.vlgmr.msra.gmra.mxu3 %vm642_vm3, %v2429_v13  ;;  %2924 = vmatmul.msk.f32.vlgmr.msrb.gmra.mxu1 %vm642_vm3, %v3793_v49  ;;  %v2735_v31 = vperm.slane %v2731_v18, 5 }
 0x30d   :  { %2931 = vmatpush.msk.msra.mxu1 %vm645_vm1, %v2415_v43  ;;  %2914 = vmatmul.msk.f32.vlgmr.msra.gmra.mxu0 %vm642_vm3, %v2429_v13  ;;  %v2742_v43 = vld.sshfl [vmem:[#allocation1 + $0x8] sm:$0xff pattern:$0x75316420] }
 0x30e   :  { %v2386_v44 = vpop.permute.xlu1 %2385 }
 0x30f   :  { %v2387_v38 = vsel %vm315_vm0, %v2384_v17, %v2386_v44  ;;  %v2390_v4 = vsel %vm315_vm0, %v2386_v44, %v2380_v37  ;;  %vm3944_vm0 = vmmov %vm3943_vm5 }
 0x310   :  { %2927 = vmatpush.msk.msrb.mxu3 %vm645_vm1, %v2387_v38  ;;  %v2753_v38 = vperm.slane %v3768_v59, 5  ;;  %v2736_v59 = vperm.slane %v2732_v2, 5 }
 0x311   :  { %v2394_v48 = vpop.permute.xlu0 %2393  ;;  %2926 = vmatmul.msk.f32.vlgmr.msrb.gmra.mxu2 %vm642_vm3, %v3793_v49 }
 0x312   :  { %v2396_v1 = vsel %vm278_vm2, %v2394_v48, %v2390_v4 }
 0x313   :  { %2921 = vmatpush.msk.msrb.mxu0 %vm645_vm1, %v2396_v1 }
 0x314   :  { %2928 = vmatmul.msk.f32.vlgmr.msrb.gmra.mxu3 %vm642_vm3, %v3793_v49 }
 0x315   :  { %2929 = vmatpush.msk.msra.mxu0 %vm645_vm1, %v2416_v50 }
 0x316   :  { %2922 = vmatmul.msk.f32.vlgmr.msrb.gmra.mxu0 %vm642_vm3, %v3793_v49  ;;  %v2421_v54 = vpop.permute.xlu1 %2420 }
 0x317   :  { %v2426_v55 = vsel %vm3944_vm0, %v2421_v54, %v2417_v51 }
 0x318   :  { %2935 = vmatpush.msk.msra.mxu3 %vm645_vm1, %v2426_v55  ;;  %v2749_v55 = vmul.f32 %v2741_v40, %v2734_v52 }
 0x31e   :  { %v2619_v28 = vpop.permute.xlu1 %2618 }
 0x31f   :  { %2930 = vmatmul.msk.f32.vlgmr.msra.gmra.mxu0 %vm642_vm3, %v2619_v28  ;;  %2932 = vmatmul.msk.f32.vlgmr.msra.gmra.mxu1 %vm642_vm3, %v2619_v28 }
 0x320   :  { %2934 = vmatmul.msk.f32.vlgmr.msra.gmra.mxu2 %vm642_vm3, %v2619_v28  ;;  %2936 = vmatmul.msk.f32.vlgmr.msra.gmra.mxu3 %vm642_vm3, %v2619_v28  ;;  %v2750_v28 = vmul.f32 %v2742_v43, %v2735_v31 }
 0x366   :  { %v2229_v61 = vpop.f32.mrf.mxu1 }
 0x367   :  { %v2230_v10 = vadd.f32 %v2229_v61, %v2135_v5 }
 0x36c   :  { %v2249_v7 = vpop.f32.mrf.mxu2 }
 0x36d   :  { %v2250_v35 = vadd.f32 %v2249_v7, %v2155_v60 }
 0x376   :  { %v2325_v49 = vpop.f32.mrf.mxu1 }
 0x377   :  { %v2369_v3 = vadd.f32 %v2325_v49, %v2230_v10  ;;  %v2744_v49 = vld.sshfl [vmem:[#allocation1 + $0x18] sm:$0xff pattern:$0x75316420] }
 0x37a   :  { %v2209_v58 = vpop.f32.mrf.mxu0 }
 0x37b   :  { %v2210_v11 = vadd.f32 %v2209_v58, %v2115_v57 }
 0x37e   :  { %v2481_v41 = vpop.f32.mrf.mxu1 }
 0x37f   :  { %v2269_v16 = vpop.f32.mrf.mxu3 }
 0x380   :  { %v2270_v36 = vadd.f32 %v2269_v16, %v2175_v6  ;;  %v2737_v16 = vperm.slane %v2733_v30, 5 }
 0x382   :  { %v2305_v8 = vpop.f32.mrf.mxu0  ;;  %v2752_v10 = vmul.f32 %v2744_v49, %v2737_v16 }
 0x383   :  { %v2368_v21 = vadd.f32 %v2305_v8, %v2210_v11 }
 0x384   :  { %v2345_v25 = vpop.f32.mrf.mxu2 }
 0x385   :  { %v2370_v50 = vadd.f32 %v2345_v25, %v2250_v35  ;;  %v2743_v25 = vld.sshfl [vmem:[#allocation1 + $0x10] sm:$0xff pattern:$0x75316420] }
 0x387   :  { %v2365_v62 = vpop.f32.mrf.mxu3 }
 0x388   :  { %v2371_v51 = vadd.f32 %v2365_v62, %v2270_v36 }
 0x389   :  { %v2575_v63 = vpop.f32.mrf.mxu1 }
 0x38a   :  { %v2461_v0 = vpop.f32.mrf.mxu0  ;;  %v2576_v12 = vadd.f32 %v2575_v63, %v2481_v41  ;;  %v2755_v41 = vperm.slane %v3764_v56, 5  ;;  %v2751_v63 = vmul.f32 %v2743_v25, %v2736_v59 }
 0x38c   :  { %v2501_v29 = vpop.f32.mrf.mxu2 }
 0x38f   :  { %v2521_v42 = vpop.f32.mrf.mxu3 }
 0x393   :  { %v2555_v9 = vpop.f32.mrf.mxu0 }
 0x394   :  { %v2556_v13 = vadd.f32 %v2555_v9, %v2461_v0  ;;  %v2595_v15 = vpop.f32.mrf.mxu2 }
 0x395   :  { %v2596_v37 = vadd.f32 %v2595_v15, %v2501_v29  ;;  %v2756_v29 = vperm.slane %v3753_v34, 5 }
 0x397   :  { %v2615_v17 = vpop.f32.mrf.mxu3 }
 0x398   :  { %v2616_v39 = vadd.f32 %v2615_v17, %v2521_v42 }
 0x39c   :  { %v2651_v14 = vpop.f32.mrf.mxu0  ;;  %v2671_v53 = vpop.f32.mrf.mxu1 }
 0x39d   :  { %v2714_v22 = vadd.f32 %v2651_v14, %v2556_v13  ;;  %v2715_v23 = vadd.f32 %v2671_v53, %v2576_v12 }
 0x39f   :  { %v2718_v26 = vadd.f32 %v2714_v22, %v2368_v21  ;;  %v2719_v27 = vadd.f32 %v2715_v23, %v2369_v3 }
 0x3a1   :  { %v2722_v32 = vadd.f32 %v2718_v26, %v3729_v46  ;;  %v2723_v33 = vadd.f32 %v2719_v27, %v3726_v45 }
 0x3a3   :  { %v2726_v44 = vmax.f32 %v2722_v32, 0.0  ;;  %v2727_v4 = vmax.f32 %v2723_v33, 0.0  ;;  %v2691_v48 = vpop.f32.mrf.mxu2  ;;  %v2711_v1 = vpop.f32.mrf.mxu3 }
 0x3a4   :  { %v2716_v46 = vadd.f32 %v2691_v48, %v2596_v37  ;;  %v2717_v54 = vadd.f32 %v2711_v1, %v2616_v39 }
 0x3a5   :  { %v2757_v45 = vmul.f32 %v2753_v38, %v2726_v44  ;;  %v2758_v5 = vmul.f32 %v2754_v20, %v2727_v4 }
 0x3a6   :  { %v2720_v57 = vadd.f32 %v2716_v46, %v2370_v50  ;;  %v2721_v60 = vadd.f32 %v2717_v54, %v2371_v51 }
 0x3a7   :  { %v2761_v6 = vadd.f32 %v2757_v45, %v2749_v55  ;;  %v2762_v61 = vadd.f32 %v2758_v5, %v2750_v28 }
 0x3a8   :  { %v2724_v58 = vadd.f32 %v2720_v57, %v3731_v47  ;;  %v2725_v7 = vadd.f32 %v2721_v60, %v3720_v24 }
 0x3a9   :  { %v2769_v8 = vrot.slane %v2762_v61, 4 }
 0x3aa   :  { %v2728_v62 = vmax.f32 %v2724_v58, 0.0  ;;  %v2729_v0 = vmax.f32 %v2725_v7, 0.0 }
 0x3ab   :  { %v2771_v42 = vsel %vm645_vm1, %v2761_v6, %v2769_v8 }
 0x3ac   :  { %v2759_v9 = vmul.f32 %v2755_v41, %v2728_v62  ;;  %v2760_v11 = vmul.f32 %v2756_v29, %v2729_v0  ;;  %2775 = vst [vmem:[#allocation20] sm:$0xff] %v2771_v42 }
 0x3ae   :  { %v2763_v47 = vadd.f32 %v2759_v9, %v2751_v63  ;;  %v2764_v12 = vadd.f32 %v2760_v11, %v2752_v10 }
 0x3b0   :  { %v2770_v24 = vrot.slane %v2764_v12, 4 }
 0x3b2   :  { %v2772_v34 = vsel %vm645_vm1, %v2763_v47, %v2770_v24 }
 0x3b3   :  { %2776 = vst [vmem:[#allocation20 + $0x8] sm:$0xff] %v2772_v34 }
 0x3b4   :  { %2787 = dma.vmem_to_hbm [thread:$0]  %s2783_s1, 256, %s2785_s22, [#allocation4]  }
 0x3b5   :  { %3279 = dma.done.wait [#allocation4], 256  }
 0x3b6   :  { %3280 = vsyncadd [#allocation4], 4294967040 }
 0x3b7   :  { %2792 = vsyncpa [#allocation3], 1 }
 0x3b8   :  { %2793 = vsyncpa [#allocation6], 1 }
 0x3b9   :  { %2794 = vsyncpa [#allocation9], 1 }
 0x3ba   :  { %2795 = vsyncpa [#allocation12], 1 }
 0x3bb   :  { %2796 = vsyncpa [#allocation15], 1 }
 0x3bc   :  { %2797 = vsyncpa [#allocation18], 1 }
 0x3bd   :  { %2798 = vsyncpa [#allocation4], 1 }

</bundles_post_ra>
